<compile_context>
chip_gen: v5e
topology: v5e:2x2
jax: 0.10.0
libtpu: 0.0.40
codegen_flags: <defaults>
</compile_context>

<pallas_src>
import functools
import math

import jax
import jax.numpy as jnp
from jax.experimental import pallas as pl
from jax.experimental.pallas import tpu as pltpu


def _round_up(x, m):
    return (x + m - 1) // m * m


def _rgcn_layer_kernel(adj_ref, x_ref, w_ref, wroot_ref, b_ref, o_ref, *,
                       tm, num_relations, valid_out, apply_relu,
                       apply_log_softmax):
    """One RGCN layer for a tile of TM output rows.

    adj_ref  : [R, TM, N_pad]   adjacency rows for this tile (all relations)
    x_ref    : [N_pad, F_in]    full node features (resident across the grid)
    w_ref    : [R, F_in, F_out_pad]  per-relation weights (zero-padded lanes)
    wroot_ref: [F_in, F_out_pad]     root/self weight
    b_ref    : [1, F_out_pad]        bias (zero-padded lanes)
    o_ref    : [TM, F_out_pad]       lane-dense output tile
    """
    pid = pl.program_id(0)
    row0 = pl.multiple_of(pid * tm, tm)
    x_tile = x_ref[pl.ds(row0, tm), :]                       # [TM, F_in]

    # Root/self term + bias (f32 accumulation).
    acc = jnp.dot(x_tile, wroot_ref[...], preferred_element_type=jnp.float32)
    acc = acc + b_ref[...]

    # Relational message passing, reassociated as (A_r @ X) @ W_r so the big
    # [TM, N_pad] x [N_pad, F_in] matmul contracts over F_in, not F_out_pad.
    for r in range(num_relations):                           # static, R is small
        az = jnp.dot(adj_ref[r], x_ref[...],
                     preferred_element_type=jnp.float32)     # [TM, F_in]
        acc = acc + jnp.dot(az, w_ref[r],
                            preferred_element_type=jnp.float32)

    if apply_relu:
        acc = jnp.maximum(acc, 0.0)

    if apply_log_softmax:
        # Masked log_softmax over the first `valid_out` (real) classes only;
        # padded lanes are excluded from the normalizer and written as 0.
        cols = jax.lax.broadcasted_iota(jnp.int32, acc.shape, 1)
        valid = cols < valid_out
        masked = jnp.where(valid, acc, jnp.float32(-1e30))
        m = jnp.max(masked, axis=-1, keepdims=True)
        lse = m + jnp.log(jnp.sum(jnp.exp(masked - m), axis=-1, keepdims=True))
        acc = jnp.where(valid, acc - lse, 0.0)

    o_ref[...] = acc.astype(o_ref.dtype)


def _rgcn_dense_layer(adj_pad, x_pad, w_rel, w_root, bias, *, tm,
                      apply_relu=False, apply_log_softmax=False,
                      valid_out=None, out_dtype=jnp.float32):
    """Fused dense RGCN layer. All inputs pre-padded: rows to a multiple of tm,
    output features to a multiple of 128 (lane-dense)."""
    num_relations, n_pad, _ = adj_pad.shape
    f_in = x_pad.shape[1]
    f_out_pad = w_rel.shape[2]
    assert n_pad % tm == 0 and tm % 8 == 0 and f_out_pad % 128 == 0

    kernel = functools.partial(
        _rgcn_layer_kernel,
        tm=tm,
        num_relations=num_relations,
        valid_out=(f_out_pad if valid_out is None else valid_out),
        apply_relu=apply_relu,
        apply_log_softmax=apply_log_softmax,
    )

    return pl.pallas_call(
        kernel,
        out_shape=jax.ShapeDtypeStruct((n_pad, f_out_pad), out_dtype),
        grid=(n_pad // tm,),
        in_specs=[
            # Adjacency: only this tile's TM rows (all relations) are DMA'd per step.
            pl.BlockSpec((num_relations, tm, n_pad), lambda i: (0, i, 0)),
            # Full node features / weights / bias: constant block, stays resident.
            pl.BlockSpec((n_pad, f_in), lambda i: (0, 0)),
            pl.BlockSpec((num_relations, f_in, f_out_pad), lambda i: (0, 0, 0)),
            pl.BlockSpec((f_in, f_out_pad), lambda i: (0, 0)),
            pl.BlockSpec((1, f_out_pad), lambda i: (0, 0)),
        ],
        out_specs=pl.BlockSpec((tm, f_out_pad), lambda i: (i, 0)),
        compiler_params=pltpu.CompilerParams(
            # Row tiles are independent -> parallel (lets v7x shard across both TCs).
            dimension_semantics=("parallel",),
            vmem_limit_bytes=32 * 1024 * 1024,
        ),
    )(adj_pad, x_pad, w_rel, w_root, bias)


def rgcn_withmask_forward(embed_weight, edge_index, edge_type, params,
                          num_relations, num_classes, *, tm=128,
                          compute_dtype=jnp.float32):
    """Full RGCN_withmask forward: embed -> conv1 -> relu -> conv2 -> log_softmax."""
    (w1, root1, b1), (w2, root2, b2) = params
    num_entities, hidden = embed_weight.shape

    n_pad = _round_up(num_entities, max(tm, 128))
    f1_pad = _round_up(hidden, 128)        # lane-dense layer-1 output width
    f2_pad = _round_up(num_classes, 128)   # lane-dense layer-2 output width

    # Dense per-relation, mean-normalized adjacency built at padded size
    # (message-passing graph -> dense matmul operand; done once in plain JAX).
    src, dst = edge_index[0], edge_index[1]
    adj = jnp.zeros((num_relations, n_pad, n_pad), jnp.float32)
    adj = adj.at[edge_type, dst, src].add(1.0)
    deg = jnp.sum(adj, axis=2, keepdims=True)
    adj = (adj / jnp.maximum(deg, 1.0)).astype(compute_dtype)

    x0 = jnp.zeros((n_pad, hidden), jnp.float32).at[:num_entities].set(embed_weight)
    x0 = x0.astype(compute_dtype)

    # Layer 1 params, zero-padded to lane-dense output width.
    w1_p = jnp.zeros((num_relations, hidden, f1_pad), jnp.float32).at[:, :, :hidden].set(w1)
    r1_p = jnp.zeros((hidden, f1_pad), jnp.float32).at[:, :hidden].set(root1)
    b1_p = jnp.zeros((1, f1_pad), jnp.float32).at[0, :hidden].set(b1)

    h = _rgcn_dense_layer(adj, x0, w1_p, r1_p, b1_p, tm=tm, apply_relu=True)
    # h is [n_pad, f1_pad]; its padded feature columns are exactly zero, so it is
    # fed straight into layer 2 (W2 zero-padded along the input dim) with no
    # intermediate slice/copy in HBM.
    h = h.astype(compute_dtype)

    # Layer 2 params, zero-padded on both input and output feature dims.
    w2_p = jnp.zeros((num_relations, f1_pad, f2_pad), jnp.float32)
    w2_p = w2_p.at[:, :hidden, :num_classes].set(w2)
    r2_p = jnp.zeros((f1_pad, f2_pad), jnp.float32).at[:hidden, :num_classes].set(root2)
    b2_p = jnp.zeros((1, f2_pad), jnp.float32).at[0, :num_classes].set(b2)

    out = _rgcn_dense_layer(adj, h, w2_p, r2_p, b2_p, tm=tm,
                            apply_log_softmax=True, valid_out=num_classes)
    return out[:num_entities, :num_classes]


if __name__ == "__main__":
    # Small, deterministic problem consistent with the module.
    num_entities = 200
    num_relations = 3
    num_classes = 7
    hidden = 16
    num_edges = 600

    key = jax.random.PRNGKey(0)
    (k_emb, k_src, k_dst, k_type,
     k_w1, k_r1, k_b1, k_w2, k_r2, k_b2) = jax.random.split(key, 10)

    embed_weight = jax.random.normal(k_emb, (num_entities, hidden), jnp.float32)
    src = jax.random.randint(k_src, (num_edges,), 0, num_entities)
    dst = jax.random.randint(k_dst, (num_edges,), 0, num_entities)
    edge_index = jnp.stack([src, dst], axis=0)
    edge_type = jax.random.randint(k_type, (num_edges,), 0, num_relations)

    def glorot(k, shape):
        fan_in, fan_out = shape[-2], shape[-1]
        s = math.sqrt(6.0 / (fan_in + fan_out))
        return jax.random.uniform(k, shape, jnp.float32, minval=-s, maxval=s)

    w1 = glorot(k_w1, (num_relations, hidden, hidden))
    root1 = glorot(k_r1, (hidden, hidden))
    b1 = jax.random.uniform(k_b1, (hidden,), jnp.float32, minval=-0.1, maxval=0.1)
    w2 = glorot(k_w2, (num_relations, hidden, num_classes))
    root2 = glorot(k_r2, (hidden, num_classes))
    b2 = jax.random.uniform(k_b2, (num_classes,), jnp.float32, minval=-0.1, maxval=0.1)

    params = ((w1, root1, b1), (w2, root2, b2))
    out = rgcn_withmask_forward(embed_weight, edge_index, edge_type, params,
                                num_relations, num_classes)
    out = jax.block_until_ready(out)

    # Plain-JAX reference of the same dense RGCN forward (f32, highest precision).
    with jax.default_matmul_precision("highest"):
        N = num_entities
        adj_ref = jnp.zeros((num_relations, N, N), jnp.float32)
        adj_ref = adj_ref.at[edge_type, dst, src].add(1.0)
        deg = jnp.sum(adj_ref, axis=2, keepdims=True)
        adj_ref = adj_ref / jnp.maximum(deg, 1.0)

        def layer(x, w, root, b):
            y = x @ root + b
            for r in range(num_relations):
                y = y + (adj_ref[r] @ x) @ w[r]
            return y

        h_ref = jax.nn.relu(layer(embed_weight, w1, root1, b1))
        ref = jax.nn.log_softmax(layer(h_ref, w2, root2, b2), axis=1)

    assert out.shape == (num_entities, num_classes)
    assert jnp.allclose(out, ref, atol=2e-3, rtol=2e-3), "mismatch vs reference"

    print("KERNEL_OK")
</pallas_src>

<mosaic_0001>
module attributes {stable_mosaic.version = 11 : i64} {
  func.func @_rgcn_layer_kernel(%arg0: i32, %arg1: memref<3x128x256xf32, #tpu.memory_space<vmem>>, %arg2: memref<256x16xf32, #tpu.memory_space<vmem>>, %arg3: memref<3x16x128xf32, #tpu.memory_space<vmem>>, %arg4: memref<16x128xf32, #tpu.memory_space<vmem>>, %arg5: memref<1x128xf32, #tpu.memory_space<vmem>>, %arg6: memref<128x128xf32, #tpu.memory_space<vmem>>) attributes {dimension_semantics = [#tpu.dimension_semantics<parallel>], iteration_bounds = array<i64: 2>, scalar_prefetch = 0 : i64, scratch_operands = 0 : i64, tpu.core_type = #tpu.core_type<tc>, window_params = [{transform_indices = @transform_0, window_bounds = array<i64: 3, 128, 256>}, {pipeline_mode = #tpu.pipeline_mode<synchronous>, transform_indices = @transform_1, window_bounds = array<i64: 256, 16>}, {pipeline_mode = #tpu.pipeline_mode<synchronous>, transform_indices = @transform_2, window_bounds = array<i64: 3, 16, 128>}, {pipeline_mode = #tpu.pipeline_mode<synchronous>, transform_indices = @transform_3, window_bounds = array<i64: 16, 128>}, {pipeline_mode = #tpu.pipeline_mode<synchronous>, transform_indices = @transform_4, window_bounds = array<i64: 1, 128>}, {transform_indices = @transform_5, window_bounds = array<i64: 128, 128>}]} {
    %c128_i32 = arith.constant 128 : i32
    %0 = arith.muli %arg0, %c128_i32 : i32
    %1 = tpu.assume_multiple %0, 128 : i32
    %2 = arith.index_cast %1 : i32 to index
    %c0 = arith.constant 0 : index
    %3 = vector.load %arg2[%2, %c0] : memref<256x16xf32, #tpu.memory_space<vmem>>, vector<128x16xf32>
    %c0_0 = arith.constant 0 : index
    %c0_1 = arith.constant 0 : index
    %4 = vector.load %arg4[%c0_0, %c0_1] : memref<16x128xf32, #tpu.memory_space<vmem>>, vector<16x128xf32>
    %cst = arith.constant dense<0.000000e+00> : vector<128x128xf32>
    %5 = tpu.matmul %3, %4, %cst {dimension_numbers = #tpu.dot_dimension_numbers<[1], [0], [0], [1], [0, 0, 1, 1], [], []>} : vector<128x16xf32>, vector<16x128xf32>, vector<128x128xf32> -> vector<128x128xf32>
    %c0_2 = arith.constant 0 : index
    %c0_3 = arith.constant 0 : index
    %6 = vector.load %arg5[%c0_2, %c0_3] : memref<1x128xf32, #tpu.memory_space<vmem>>, vector<1x128xf32>
    %7 = vector.broadcast %6 : vector<1x128xf32> to vector<128x128xf32>
    %8 = arith.addf %5, %7 : vector<128x128xf32>
    %c0_4 = arith.constant 0 : index
    %c0_5 = arith.constant 0 : index
    %c0_6 = arith.constant 0 : index
    %9 = vector.load %arg1[%c0_4, %c0_5, %c0_6] : memref<3x128x256xf32, #tpu.memory_space<vmem>>, vector<1x128x256xf32>
    %10 = vector.shape_cast %9 : vector<1x128x256xf32> to vector<128x256xf32>
    %c0_7 = arith.constant 0 : index
    %c0_8 = arith.constant 0 : index
    %11 = vector.load %arg2[%c0_7, %c0_8] : memref<256x16xf32, #tpu.memory_space<vmem>>, vector<256x16xf32>
    %cst_9 = arith.constant dense<0.000000e+00> : vector<128x16xf32>
    %12 = tpu.matmul %10, %11, %cst_9 {dimension_numbers = #tpu.dot_dimension_numbers<[1], [0], [0], [1], [0, 0, 1, 1], [], []>} : vector<128x256xf32>, vector<256x16xf32>, vector<128x16xf32> -> vector<128x16xf32>
    %c0_10 = arith.constant 0 : index
    %c0_11 = arith.constant 0 : index
    %c0_12 = arith.constant 0 : index
    %13 = vector.load %arg3[%c0_10, %c0_11, %c0_12] : memref<3x16x128xf32, #tpu.memory_space<vmem>>, vector<1x16x128xf32>
    %14 = vector.shape_cast %13 : vector<1x16x128xf32> to vector<16x128xf32>
    %cst_13 = arith.constant dense<0.000000e+00> : vector<128x128xf32>
    %15 = tpu.matmul %12, %14, %cst_13 {dimension_numbers = #tpu.dot_dimension_numbers<[1], [0], [0], [1], [0, 0, 1, 1], [], []>} : vector<128x16xf32>, vector<16x128xf32>, vector<128x128xf32> -> vector<128x128xf32>
    %16 = arith.addf %8, %15 : vector<128x128xf32>
    %c1 = arith.constant 1 : index
    %c0_14 = arith.constant 0 : index
    %c0_15 = arith.constant 0 : index
    %17 = vector.load %arg1[%c1, %c0_14, %c0_15] : memref<3x128x256xf32, #tpu.memory_space<vmem>>, vector<1x128x256xf32>
    %18 = vector.shape_cast %17 : vector<1x128x256xf32> to vector<128x256xf32>
    %c0_16 = arith.constant 0 : index
    %c0_17 = arith.constant 0 : index
    %19 = vector.load %arg2[%c0_16, %c0_17] : memref<256x16xf32, #tpu.memory_space<vmem>>, vector<256x16xf32>
    %cst_18 = arith.constant dense<0.000000e+00> : vector<128x16xf32>
    %20 = tpu.matmul %18, %19, %cst_18 {dimension_numbers = #tpu.dot_dimension_numbers<[1], [0], [0], [1], [0, 0, 1, 1], [], []>} : vector<128x256xf32>, vector<256x16xf32>, vector<128x16xf32> -> vector<128x16xf32>
    %c1_19 = arith.constant 1 : index
    %c0_20 = arith.constant 0 : index
    %c0_21 = arith.constant 0 : index
    %21 = vector.load %arg3[%c1_19, %c0_20, %c0_21] : memref<3x16x128xf32, #tpu.memory_space<vmem>>, vector<1x16x128xf32>
    %22 = vector.shape_cast %21 : vector<1x16x128xf32> to vector<16x128xf32>
    %cst_22 = arith.constant dense<0.000000e+00> : vector<128x128xf32>
    %23 = tpu.matmul %20, %22, %cst_22 {dimension_numbers = #tpu.dot_dimension_numbers<[1], [0], [0], [1], [0, 0, 1, 1], [], []>} : vector<128x16xf32>, vector<16x128xf32>, vector<128x128xf32> -> vector<128x128xf32>
    %24 = arith.addf %16, %23 : vector<128x128xf32>
    %c2 = arith.constant 2 : index
    %c0_23 = arith.constant 0 : index
    %c0_24 = arith.constant 0 : index
    %25 = vector.load %arg1[%c2, %c0_23, %c0_24] : memref<3x128x256xf32, #tpu.memory_space<vmem>>, vector<1x128x256xf32>
    %26 = vector.shape_cast %25 : vector<1x128x256xf32> to vector<128x256xf32>
    %c0_25 = arith.constant 0 : index
    %c0_26 = arith.constant 0 : index
    %27 = vector.load %arg2[%c0_25, %c0_26] : memref<256x16xf32, #tpu.memory_space<vmem>>, vector<256x16xf32>
    %cst_27 = arith.constant dense<0.000000e+00> : vector<128x16xf32>
    %28 = tpu.matmul %26, %27, %cst_27 {dimension_numbers = #tpu.dot_dimension_numbers<[1], [0], [0], [1], [0, 0, 1, 1], [], []>} : vector<128x256xf32>, vector<256x16xf32>, vector<128x16xf32> -> vector<128x16xf32>
    %c2_28 = arith.constant 2 : index
    %c0_29 = arith.constant 0 : index
    %c0_30 = arith.constant 0 : index
    %29 = vector.load %arg3[%c2_28, %c0_29, %c0_30] : memref<3x16x128xf32, #tpu.memory_space<vmem>>, vector<1x16x128xf32>
    %30 = vector.shape_cast %29 : vector<1x16x128xf32> to vector<16x128xf32>
    %cst_31 = arith.constant dense<0.000000e+00> : vector<128x128xf32>
    %31 = tpu.matmul %28, %30, %cst_31 {dimension_numbers = #tpu.dot_dimension_numbers<[1], [0], [0], [1], [0, 0, 1, 1], [], []>} : vector<128x16xf32>, vector<16x128xf32>, vector<128x128xf32> -> vector<128x128xf32>
    %32 = arith.addf %24, %31 : vector<128x128xf32>
    %cst_32 = arith.constant 0.000000e+00 : f32
    %33 = vector.broadcast %cst_32 : f32 to vector<128x128xf32>
    %34 = arith.maximumf %32, %33 : vector<128x128xf32>
    %c0_33 = arith.constant 0 : index
    %c0_34 = arith.constant 0 : index
    %35 = vector.load %arg6[%c0_33, %c0_34] : memref<128x128xf32, #tpu.memory_space<vmem>>, vector<128x128xf32>
    tpu.vector_store %arg6[%c0_33, %c0_34], %34 {strides = array<i32>} : memref<128x128xf32, #tpu.memory_space<vmem>>, vector<128x128xf32>,
    return
  }
  func.func @transform_0(%arg0: i32) -> (i32, i32, i32) {
    %c0_i32 = arith.constant 0 : i32
    %c0_i32_0 = arith.constant 0 : i32
    %c0_i32_1 = arith.constant 0 : i32
    return %c0_i32, %arg0, %c0_i32_0 : i32, i32, i32
  }
  func.func @transform_1(%arg0: i32) -> (i32, i32) {
    %c0_i32 = arith.constant 0 : i32
    %c0_i32_0 = arith.constant 0 : i32
    %c0_i32_1 = arith.constant 0 : i32
    return %c0_i32, %c0_i32_0 : i32, i32
  }
  func.func @transform_2(%arg0: i32) -> (i32, i32, i32) {
    %c0_i32 = arith.constant 0 : i32
    %c0_i32_0 = arith.constant 0 : i32
    %c0_i32_1 = arith.constant 0 : i32
    %c0_i32_2 = arith.constant 0 : i32
    return %c0_i32, %c0_i32_0, %c0_i32_1 : i32, i32, i32
  }
  func.func @transform_3(%arg0: i32) -> (i32, i32) {
    %c0_i32 = arith.constant 0 : i32
    %c0_i32_0 = arith.constant 0 : i32
    %c0_i32_1 = arith.constant 0 : i32
    return %c0_i32, %c0_i32_0 : i32, i32
  }
  func.func @transform_4(%arg0: i32) -> (i32, i32) {
    %c0_i32 = arith.constant 0 : i32
    %c0_i32_0 = arith.constant 0 : i32
    %c0_i32_1 = arith.constant 0 : i32
    return %c0_i32, %c0_i32_0 : i32, i32
  }
  func.func @transform_5(%arg0: i32) -> (i32, i32) {
    %c0_i32 = arith.constant 0 : i32
    %c0_i32_0 = arith.constant 0 : i32
    return %arg0, %c0_i32 : i32, i32
  }
}

</mosaic_0001>

<bundles_post_ra>
// kernel: tpu_custom_call.1
= control target key start
LH: loop header
LB: loop body
LE: loop exit
PB: predicated region body
PF: predicated region fallthrough
CT: control target
= control target key end

     0   :  { %10 = vsyncpa [#allocation3], 0  ;;  %s2614_s0 = inlined_call_operand.hbm [shape: f32[3,256,256], index: 0, kind: input, shape index: {}]   ;;  %s2615_s1 = inlined_call_operand.vmem [shape: f32[256,16], index: 1, kind: input, shape index: {}]   ;;  %s2616_s2 = inlined_call_operand.vmem [shape: f32[3,16,128], index: 2, kind: input, shape index: {}]   ;;  %s2617_s3 = inlined_call_operand.vmem [shape: f32[16,128], index: 3, kind: input, shape index: {}]   ;;  %s2618_s4 = inlined_call_operand.vmem [shape: f32[1,128], index: 4, kind: input, shape index: {}]   ;;  %s2619_s5 = inlined_call_operand.hbm [shape: f32[256,128], index: 5, kind: output, shape index: {}]  }
   0x1   :  { %12 = vsyncpa [#allocation3 + $0x1], 0 }
   0x2   :  { %13 = vsyncpa [#allocation4], 0 }
   0x3   :  { %15 = vsyncpa [#allocation4 + $0x1], 0  ;;  %s1783_s18 = smov 0   ;;  %s1785_s19 = smov 0  }
   0x4   :  { %s1787_s20 = smov 0   ;;  %s1789_s21 = smov 0  }
   0x5 LB: > { %s1804_s22 = sadd.s32 4294967295, %s1744_s21   ;;  %s1449_s23 = sadd.s32 4294967294, %s1744_s21   ;;  %s1744_s21 = sphi %s1789_s21, %s2627_s21   ;;  %s1740_s20 = sphi %s1787_s20, %s2626_s20   ;;  %s1736_s19 = sphi %s1785_s19, %s2625_s19   ;;  %s1732_s18 = sphi %s1783_s18, %s2624_s18  }
   0x6   : > { %s1808_s24 = sadd.s32 1, %s1744_s21   ;;  %s28_s25 = sadd.s32 1, %s1740_s20 }
   0x7   : > { %s25_s26 = ssub.s32 %s1744_s21, %s1808_s24  ;;  %p35_p0 = scmp.ne.s32.totalorder %s1740_s20, %s1736_s19 }
   0x8   : > { %p26_p1 = scmp.eq.s32.totalorder %s25_s26, 0  ;;  %p36_p2 = scmp.eq.s32.totalorder %s1744_s21, 0 }
   0x9   : > { %p41_p3 = scmp.ne.s32.totalorder %s1736_s19, %s1732_s18  ;;  %p42_p4 = scmp.eq.s32.totalorder %s1804_s22, 0 }
   0xa   : > { %s1820_s27 = scalar_select %p26_p1, %s1740_s20, %s28_s25  }
   0xb   : > { %p1822_p5 = por %p36_p2, %p35_p0  ;;  %p1826_p6 = por %p42_p4, %p41_p3 }
   0xc   : > { %p149_p7 = scmp.eq.s32.totalorder %s1804_s22, 1  ;;  %p155_p8 = scmp.eq.s32.totalorder %s1449_s23, 1 }
   0xd   : > { %p1451_p11 = scmp.ge.s32.totalorder %s1744_s21, 2 }
   0xe   : > { %p1831_p9 = por %p149_p7, %p35_p0  ;;  %p1835_p10 = por %p155_p8, %p41_p3 }
   0xf   : > { %183 = sbr.rel (%p1451_p11) target bundleno = 34 (0x22), region = 32 }
  0x14   : > { %s187_s7 = sand.u32 1, %s1740_s20   ;;  %s1598_s8 = sshll.u32 %s1744_s21, 8 }
  0x15   : > { %s1620_s9 = smul.u32 768, %s187_s7  ;;  %s197_s12 = scalar_lea.hbm %s2614_s0, %s1598_s8 }
  0x16   : > { %s210_s13 = sshll.u32 %s197_s12, 4  ;;  %s1746_s23 = smov 8192   ;;  %s211_s13 = int_to_ptr.hbm [resolvable:$true] %s210_s13 }
  0x17   : > { %s1622_s14 = scalar_select %p1822_p5, [#allocation0], [#allocation8] }
  0x18   : > { %s191_s16 = scalar_lea.vmem [#allocation2], %s1620_s9  ;;  %1623 = sst [smem:[#allocation7]] (%p1822_p5), %s1746_s23 }
  0x19   : > { %s202_s15 = sld [smem:[%s1622_s14]]   ;;  %s212_s17 = sshll.u32 %s191_s16, 4  ;;  %s213_s17 = int_to_ptr.vmem [resolvable:$true] %s212_s17 }
  0x1a   : > { %s1747_s25 = smov 4096   ;;  %s1748_s26 = smov 16  }
  0x1b   : > { %1624 = sst [smem:[#allocation7 + $0x1]] (%p1822_p5), %s1747_s25  ;;  %s1749_s8 = smov 256  }
  0x1c   : > { %1625 = sst [smem:[#allocation7 + $0x2]] (%p1822_p5), %s1748_s26  ;;  %s188_s11 = scalar_lea.sflag [#allocation3], %s187_s7 }
  0x1d   : > { %1626 = sst [smem:[#allocation7 + $0x3]] (%p1822_p5), %s1749_s8  ;;  %s1750_s12 = smov [#allocation6]  }
  0x1e   : > { %1627 = sst [smem:[#allocation7 + $0x4]] (%p1822_p5), %s1749_s8 }
  0x1f   : > { %s1455_s10 = sshll.u32 %s202_s15, 26  ;;  %1628 = sst [smem:[#allocation7 + $0x5]] (%p1822_p5), %s1748_s26 }
  0x20   : > { %s1456_s9 = sadd.s32 134217728, %s1455_s10 }
  0x21   : > { %1629 = dma.general (%p1822_p5), %s211_s13, 12288, %s213_s17, %s188_s11, %s1750_s12, [#allocation7], %s1456_s9, 0  }
  0x22 PF: > { %p1457_p12 = scmp.ge.s32.totalorder %s1744_s21, 1  ;;  %p233_p13 = scmp.lt.s32.totalorder %s1744_s21, 3 }
  0x24   : > { %p234_p0 = pnand %p1457_p12, %p233_p13 }
  0x25   : > { %s1866_s14 = sand.u32 (!%p234_p0), 1, %s1736_s19  }
  0x26   : > { %237 = sbr.rel (%p234_p0) target bundleno = 810 (0x32a), region = 40  ;;  %s240_s16 = scalar_lea.sflag (!%p234_p0), [#allocation3], %s1866_s14 }
  0x27   : > { %s1621_s15 = smul.u32 (!%p234_p0), 768, %s1866_s14 }
  0x29   : > { %s1870_s23 = scalar_lea.vmem (!%p234_p0), [#allocation2], %s1621_s15 }
  0x2b   : > { %1723 = dma.done.wait (%p1826_p6), %s240_s16, 12288  }
  0x2c   : > { %1725 = vsyncadd (%p1826_p6), %s240_s16, 4294955008  ;;  %s1459_s28 = sshll.u32 %s1804_s22, 7  ;;  %v292_v0 = vld [vmem:[%s2617_s3 + $0x8] sm:$0xff]  ;;  %v291_v1 = vld [vmem:[%s2617_s3] sm:$0xff]  ;;  %vm297_vm0 = vcmask 130048   ;;  %s1458_s15 = sshll.u32 %s1866_s14, 7 }
  0x2d   : > { %s1882_s17 = scalar_lea.vmem %s2615_s1, %s1459_s28  ;;  %1600 = vmatpush.msra.mxu1 %v292_v0  ;;  %360 = vmatpush.msra.mxu0 %v292_v0  ;;  %v1894_v3 = vld [vmem:[%s2615_s1 + $0x78] sm:$0xff]  ;;  %v1900_v4 = vld [vmem:[%s2615_s1 + $0x70] sm:$0xff]  ;;  %v1918_v7 = vld [vmem:[%s2615_s1 + $0x68] sm:$0xff]  ;;  %s2519_s16 = scalar_lea.vmem [#allocation5], %s1458_s15 }
  0x2e   : > { %v284_v2 = vld [vmem:[%s1882_s17 + $0x48] sm:$0xff]  ;;  %v1905_v5 = vld [vmem:[%s2615_s1 + $0xf8] sm:$0xff]  ;;  %v1913_v6 = vld [vmem:[%s2615_s1 + $0xf0] sm:$0xff]  ;;  %s1371_s26 = sshll.u32 %s2519_s16, 4  ;;  %s1359_s22 = scalar_lea.sflag [#allocation4], %s1866_s14  ;;  %s1372_s26 = int_to_ptr.vmem [resolvable:$true] %s1371_s26 }
  0x2f   : > { %1601 = vmatpush.msra.mxu1 %v291_v1  ;;  %361 = vmatpush.msra.mxu0 %v291_v1  ;;  %v1923_v8 = vld [vmem:[%s2615_s1 + $0xe8] sm:$0xff]  ;;  %v1931_v9 = vld [vmem:[%s2615_s1 + $0x60] sm:$0xff]  ;;  %v285_v11 = vld [vmem:[%s1882_s17 + $0x50] sm:$0xff]  ;;  %s1698_s9 = scalar_lea.hbm %s2619_s5, 256 }
  0x30   : > { %1469 = vmatmul.msk.f32.vlgmr.msra.gmra.mxu1 %vm297_vm0, %v284_v2  ;;  %1602 = vmatpush.msra.mxu2 %v1905_v5  ;;  %v1936_v10 = vld [vmem:[%s2615_s1 + $0xe0] sm:$0xff]  ;;  %v1945_v12 = vld [vmem:[%s2615_s1 + $0x58] sm:$0xff]  ;;  %v1959_v14 = vld [vmem:[%s2615_s1 + $0x50] sm:$0xff] }
  0x31   : > { %769 = vmatpush.msrb.mxu0 %v1894_v3  ;;  %475 = vmatpush.msrb.mxu1 %v1894_v3  ;;  %v1950_v13 = vld [vmem:[%s2615_s1 + $0xd8] sm:$0xff]  ;;  %v1964_v15 = vld [vmem:[%s2615_s1 + $0xd0] sm:$0xff]  ;;  %v1972_v16 = vld [vmem:[%s2615_s1 + $0x48] sm:$0xff] }
  0x32   : > { %1603 = vmatpush.msra.mxu2 %v1913_v6  ;;  %v1977_v17 = vld [vmem:[%s2615_s1 + $0xc8] sm:$0xff]  ;;  %v1985_v18 = vld [vmem:[%s2615_s1 + $0x40] sm:$0xff]  ;;  %v286_v20 = vld [vmem:[%s1882_s17 + $0x58] sm:$0xff] }
  0x33   : > { %770 = vmatpush.msrb.mxu0 %v1900_v4  ;;  %476 = vmatpush.msrb.mxu1 %v1900_v4  ;;  %v1990_v19 = vld [vmem:[%s2615_s1 + $0xc0] sm:$0xff]  ;;  %v1999_v21 = vld [vmem:[%s2615_s1 + $0x38] sm:$0xff]  ;;  %v2013_v23 = vld [vmem:[%s2615_s1 + $0x30] sm:$0xff] }
  0x34   : > { %1604 = vmatpush.msra.mxu2 %v1923_v8  ;;  %v2004_v22 = vld [vmem:[%s2615_s1 + $0xb8] sm:$0xff]  ;;  %v2018_v24 = vld [vmem:[%s2615_s1 + $0xb0] sm:$0xff]  ;;  %v2026_v25 = vld [vmem:[%s2615_s1 + $0x28] sm:$0xff] }
  0x35   : > { %771 = vmatpush.msrb.mxu0 %v1918_v7  ;;  %477 = vmatpush.msrb.mxu1 %v1918_v7  ;;  %v2031_v26 = vld [vmem:[%s2615_s1 + $0xa8] sm:$0xff]  ;;  %v2039_v27 = vld [vmem:[%s2615_s1 + $0x20] sm:$0xff]  ;;  %v2053_v30 = vld [vmem:[%s2615_s1 + $0x18] sm:$0xff] }
  0x36   : > { %1605 = vmatpush.msra.mxu2 %v1936_v10  ;;  %v2044_v28 = vld [vmem:[%s2615_s1 + $0xa0] sm:$0xff]  ;;  %v2058_v31 = vld [vmem:[%s2615_s1 + $0x98] sm:$0xff]  ;;  %v2067_v32 = vld [vmem:[%s2615_s1 + $0x10] sm:$0xff] }
  0x37   : > { %772 = vmatpush.msrb.mxu0 %v1931_v9  ;;  %478 = vmatpush.msrb.mxu1 %v1931_v9  ;;  %v287_v29 = vld [vmem:[%s1882_s17 + $0x60] sm:$0xff]  ;;  %v2072_v33 = vld [vmem:[%s2615_s1 + $0x90] sm:$0xff]  ;;  %v2080_v34 = vld [vmem:[%s2615_s1 + $0x8] sm:$0xff] }
  0x38   : > { %1470 = vmatmul.msk.f32.gmra.mxu1 %vm297_vm0, %v285_v11  ;;  %1606 = vmatpush.msra.mxu2 %v1950_v13  ;;  %v2085_v35 = vld [vmem:[%s2615_s1 + $0x88] sm:$0xff]  ;;  %v2093_v36 = vld [vmem:[%s2615_s1] sm:$0xff]  ;;  %v414_v39 = vld [vmem:[%s1870_s23 + $0x18] sm:$0xff] }
  0x39   : > { %773 = vmatpush.msrb.mxu0 %v1945_v12  ;;  %479 = vmatpush.msrb.mxu1 %v1945_v12  ;;  %v2098_v37 = vld [vmem:[%s2615_s1 + $0x80] sm:$0xff]  ;;  %v288_v38 = vld [vmem:[%s1882_s17 + $0x68] sm:$0xff]  ;;  %v289_v40 = vld [vmem:[%s1882_s17 + $0x70] sm:$0xff] }
  0x3a   : > { %1607 = vmatpush.msra.mxu2 %v1964_v15  ;;  %v416_v41 = vld [vmem:[%s1870_s23 + $0x28] sm:$0xff]  ;;  %v290_v42 = vld [vmem:[%s1882_s17 + $0x78] sm:$0xff]  ;;  %v411_v44 = vld [vmem:[%s1870_s23] sm:$0xff] }
  0x3b   : > { %774 = vmatpush.msrb.mxu0 %v1959_v14  ;;  %480 = vmatpush.msrb.mxu1 %v1959_v14  ;;  %v418_v43 = vld [vmem:[%s1870_s23 + $0x38] sm:$0xff]  ;;  %v420_v45 = vld [vmem:[%s1870_s23 + $0x48] sm:$0xff]  ;;  %v413_v46 = vld [vmem:[%s1870_s23 + $0x10] sm:$0xff] }
  0x3c   : > { %1608 = vmatpush.msra.mxu2 %v1977_v17  ;;  %v422_v47 = vld [vmem:[%s1870_s23 + $0x58] sm:$0xff]  ;;  %v415_v48 = vld [vmem:[%s1870_s23 + $0x20] sm:$0xff]  ;;  %v424_v49 = vld [vmem:[%s1870_s23 + $0x68] sm:$0xff] }
  0x3d   : > { %775 = vmatpush.msrb.mxu0 %v1972_v16  ;;  %481 = vmatpush.msrb.mxu1 %v1972_v16  ;;  %v417_v50 = vld [vmem:[%s1870_s23 + $0x30] sm:$0xff]  ;;  %v426_v51 = vld [vmem:[%s1870_s23 + $0x78] sm:$0xff]  ;;  %v419_v52 = vld [vmem:[%s1870_s23 + $0x40] sm:$0xff] }
  0x3e   : > { %1609 = vmatpush.msra.mxu2 %v1990_v19  ;;  %v428_v53 = vld [vmem:[%s1870_s23 + $0x88] sm:$0xff]  ;;  %v421_v54 = vld [vmem:[%s1870_s23 + $0x50] sm:$0xff]  ;;  %v430_v55 = vld [vmem:[%s1870_s23 + $0x98] sm:$0xff] }
  0x3f   : > { %776 = vmatpush.msrb.mxu0 %v1985_v18  ;;  %482 = vmatpush.msrb.mxu1 %v1985_v18  ;;  %v423_v56 = vld [vmem:[%s1870_s23 + $0x60] sm:$0xff]  ;;  %v432_v57 = vld [vmem:[%s1870_s23 + $0xa8] sm:$0xff]  ;;  %v425_v58 = vld [vmem:[%s1870_s23 + $0x70] sm:$0xff] }
  0x40   : > { %1471 = vmatmul.msk.f32.gmra.mxu1 %vm297_vm0, %v286_v20  ;;  %1610 = vmatpush.msra.mxu2 %v2004_v22  ;;  %v434_v59 = vld [vmem:[%s1870_s23 + $0xb8] sm:$0xff]  ;;  %v427_v60 = vld [vmem:[%s1870_s23 + $0x80] sm:$0xff]  ;;  %v436_v61 = vld [vmem:[%s1870_s23 + $0xc8] sm:$0xff] }
  0x41   : > { %777 = vmatpush.msrb.mxu0 %v1999_v21  ;;  %483 = vmatpush.msrb.mxu1 %v1999_v21  ;;  %v429_v63 = vld [vmem:[%s1870_s23 + $0x90] sm:$0xff]  ;;  %v438_v0 = vld [vmem:[%s1870_s23 + $0xd8] sm:$0xff]  ;;  %v431_v2 = vld [vmem:[%s1870_s23 + $0xa0] sm:$0xff] }
  0x42   : > { %1611 = vmatpush.msra.mxu2 %v2018_v24  ;;  %v440_v11 = vld [vmem:[%s1870_s23 + $0xe8] sm:$0xff] }
  0x43   : > { %778 = vmatpush.msrb.mxu0 %v2013_v23  ;;  %484 = vmatpush.msrb.mxu1 %v2013_v23 }
  0x44   : > { %1612 = vmatpush.msra.mxu2 %v2031_v26 }
  0x45   : > { %779 = vmatpush.msrb.mxu0 %v2026_v25  ;;  %485 = vmatpush.msrb.mxu1 %v2026_v25 }
  0x46   : > { %1613 = vmatpush.msra.mxu2 %v2044_v28 }
  0x47   : > { %780 = vmatpush.msrb.mxu0 %v2039_v27  ;;  %486 = vmatpush.msrb.mxu1 %v2039_v27 }
  0x48   : > { %1472 = vmatmul.msk.f32.gmra.mxu1 %vm297_vm0, %v287_v29  ;;  %1614 = vmatpush.msra.mxu2 %v2058_v31  ;;  %v433_v29 = vld [vmem:[%s1870_s23 + $0xb0] sm:$0xff] }
  0x49   : > { %781 = vmatpush.msrb.mxu0 %v2053_v30  ;;  %487 = vmatpush.msrb.mxu1 %v2053_v30 }
  0x4a   : > { %1615 = vmatpush.msra.mxu2 %v2072_v33 }
  0x4b   : > { %782 = vmatpush.msrb.mxu0 %v2067_v32  ;;  %488 = vmatpush.msrb.mxu1 %v2067_v32 }
  0x4c   : > { %1616 = vmatpush.msra.mxu2 %v2085_v35 }
  0x4d   : > { %783 = vmatpush.msrb.mxu0 %v2080_v34  ;;  %489 = vmatpush.msrb.mxu1 %v2080_v34 }
  0x4e   : > { %1617 = vmatpush.msra.mxu2 %v2098_v37 }
  0x4f   : > { %784 = vmatpush.msrb.mxu0 %v2093_v36  ;;  %490 = vmatpush.msrb.mxu1 %v2093_v36 }
  0x50   : > { %1473 = vmatmul.msk.f32.gmra.mxu1 %vm297_vm0, %v288_v38  ;;  %559 = vmatmul.f32.vlgmr.msra.gmra.mxu2 %v414_v39  ;;  %v442_v38 = vld [vmem:[%s1870_s23 + $0xf8] sm:$0xff]  ;;  %v275_v39 = vld [vmem:[%s1882_s17] sm:$0xff] }
  0x51   : > { %540 = vmatpush.msra.mxu1 %v1905_v5  ;;  %1460 = vmatmul.msk.f32.vlgmr.msra.gmra.mxu0 %vm297_vm0, %v275_v39 }
  0x52   : > { %1129 = vmatpush.msra.mxu0 %v1905_v5 }
  0x53   : > { %541 = vmatpush.msra.mxu1 %v1913_v6 }
  0x54   : > { %1130 = vmatpush.msra.mxu0 %v1913_v6 }
  0x55   : > { %542 = vmatpush.msra.mxu1 %v1923_v8 }
  0x56   : > { %1131 = vmatpush.msra.mxu0 %v1923_v8 }
  0x57   : > { %543 = vmatpush.msra.mxu1 %v1936_v10 }
  0x58   : > { %1474 = vmatmul.msk.f32.gmra.mxu1 %vm297_vm0, %v289_v40  ;;  %562 = vmatmul.f32.gmra.mxu2 %v416_v41  ;;  %v435_v41 = vld [vmem:[%s1870_s23 + $0xc0] sm:$0xff] }
  0x59   : > { %544 = vmatpush.msra.mxu1 %v1950_v13  ;;  %1132 = vmatpush.msra.mxu0 %v1936_v10 }
  0x5b   : > { %545 = vmatpush.msra.mxu1 %v1964_v15  ;;  %1133 = vmatpush.msra.mxu0 %v1950_v13 }
  0x5d   : > { %546 = vmatpush.msra.mxu1 %v1977_v17  ;;  %1134 = vmatpush.msra.mxu0 %v1964_v15 }
  0x5f   : > { %547 = vmatpush.msra.mxu1 %v1990_v19  ;;  %1135 = vmatpush.msra.mxu0 %v1977_v17 }
  0x60   : > { %1475 = vmatmul.msk.f32.gmra.mxu1 %vm297_vm0, %v290_v42  ;;  %565 = vmatmul.f32.gmra.mxu2 %v418_v43  ;;  %v276_v42 = vld [vmem:[%s1882_s17 + $0x8] sm:$0xff] }
  0x61   : > { %548 = vmatpush.msra.mxu1 %v2004_v22  ;;  %1461 = vmatmul.msk.f32.gmra.mxu0 %vm297_vm0, %v276_v42  ;;  %v1492_v42 = vld [vmem:[%s1870_s23 + $0x100] sm:$0xff] }
  0x62   : > { %1136 = vmatpush.msra.mxu0 %v1990_v19 }
  0x63   : > { %549 = vmatpush.msra.mxu1 %v2018_v24 }
  0x64   : > { %1137 = vmatpush.msra.mxu0 %v2004_v22 }
  0x65   : > { %550 = vmatpush.msra.mxu1 %v2031_v26 }
  0x66   : > { %1138 = vmatpush.msra.mxu0 %v2018_v24 }
  0x67   : > { %551 = vmatpush.msra.mxu1 %v2044_v28 }
  0x68   : > { %491 = vmatmul.f32.vlgmr.msrb.gmra.mxu1 %v411_v44  ;;  %568 = vmatmul.f32.gmra.mxu2 %v420_v45  ;;  %v437_v44 = vld [vmem:[%s1870_s23 + $0xd0] sm:$0xff] }
  0x69   : > { %552 = vmatpush.msra.mxu1 %v2058_v31  ;;  %v277_v45 = vld [vmem:[%s1882_s17 + $0x10] sm:$0xff]  ;;  %1139 = vmatpush.msra.mxu0 %v2031_v26 }
  0x6a   : > { %1462 = vmatmul.msk.f32.gmra.mxu0 %vm297_vm0, %v277_v45 }
  0x6b   : > { %553 = vmatpush.msra.mxu1 %v2072_v33  ;;  %1140 = vmatpush.msra.mxu0 %v2044_v28 }
  0x6d   : > { %554 = vmatpush.msra.mxu1 %v2085_v35  ;;  %1141 = vmatpush.msra.mxu0 %v2058_v31 }
  0x6f   : > { %555 = vmatpush.msra.mxu1 %v2098_v37  ;;  %1142 = vmatpush.msra.mxu0 %v2072_v33 }
  0x70   : > { %494 = vmatmul.f32.gmra.mxu1 %v413_v46  ;;  %571 = vmatmul.f32.gmra.mxu2 %v422_v47  ;;  %v606_v46 = vld [vmem:[%s2616_s2 + $0x8] sm:$0xff] }
  0x71   : > { %669 = vmatpush.msrb.mxu2 %v606_v46  ;;  %1618 = vmatpush.msra.mxu3 %v606_v46 }
  0x72   : > { %1143 = vmatpush.msra.mxu0 %v2085_v35 }
  0x74   : > { %1144 = vmatpush.msra.mxu0 %v2098_v37 }
  0x78   : > { %497 = vmatmul.f32.gmra.mxu1 %v415_v48  ;;  %574 = vmatmul.f32.gmra.mxu2 %v424_v49  ;;  %v439_v49 = vld [vmem:[%s1870_s23 + $0xe0] sm:$0xff] }
  0x80   : > { %500 = vmatmul.f32.gmra.mxu1 %v417_v50  ;;  %577 = vmatmul.f32.gmra.mxu2 %v426_v51  ;;  %v278_v50 = vld [vmem:[%s1882_s17 + $0x18] sm:$0xff] }
  0x81   : > { %1463 = vmatmul.msk.f32.gmra.mxu0 %vm297_vm0, %v278_v50 }
  0x88   : > { %503 = vmatmul.f32.gmra.mxu1 %v419_v52  ;;  %580 = vmatmul.f32.gmra.mxu2 %v428_v53  ;;  %v441_v53 = vld [vmem:[%s1870_s23 + $0xf0] sm:$0xff] }
  0x90   : > { %506 = vmatmul.f32.gmra.mxu1 %v421_v54  ;;  %583 = vmatmul.f32.gmra.mxu2 %v430_v55  ;;  %v279_v54 = vld [vmem:[%s1882_s17 + $0x20] sm:$0xff] }
  0x91   : > { %1464 = vmatmul.msk.f32.gmra.mxu0 %vm297_vm0, %v279_v54 }
  0x98   : > { %509 = vmatmul.f32.gmra.mxu1 %v423_v56  ;;  %586 = vmatmul.f32.gmra.mxu2 %v432_v57  ;;  %v412_v57 = vld [vmem:[%s1870_s23 + $0x8] sm:$0xff] }
  0xa0   : > { %512 = vmatmul.f32.gmra.mxu1 %v425_v58  ;;  %589 = vmatmul.f32.gmra.mxu2 %v434_v59  ;;  %v280_v58 = vld [vmem:[%s1882_s17 + $0x28] sm:$0xff] }
  0xa1   : > { %1465 = vmatmul.msk.f32.gmra.mxu0 %vm297_vm0, %v280_v58 }
  0xa8   : > { %515 = vmatmul.f32.gmra.mxu1 %v427_v60  ;;  %592 = vmatmul.f32.gmra.mxu2 %v436_v61  ;;  %v281_v61 = vld [vmem:[%s1882_s17 + $0x30] sm:$0xff] }
  0xa9   : > { %1466 = vmatmul.msk.f32.gmra.mxu0 %vm297_vm0, %v281_v61 }
  0xad   : > { %v2149_v62 = vpop.f32.mrf.mxu1 }
  0xb0   : > { %518 = vmatmul.f32.gmra.mxu1 %v429_v63  ;;  %595 = vmatmul.f32.gmra.mxu2 %v438_v0  ;;  %v282_v0 = vld [vmem:[%s1882_s17 + $0x38] sm:$0xff] }
  0xb1   : > { %1467 = vmatmul.msk.f32.gmra.mxu0 %vm297_vm0, %v282_v0  ;;  %v1514_v0 = vld [vmem:[%s1870_s23 + $0x1b0] sm:$0xff] }
  0xb5   : > { %v2153_v1 = vpop.f32.mrf.mxu1 }
  0xb8   : > { %521 = vmatmul.f32.gmra.mxu1 %v431_v2  ;;  %598 = vmatmul.f32.gmra.mxu2 %v440_v11 }
  0xbd   : > { %v2157_v20 = vpop.f32.mrf.mxu1 }
  0xc0   : > { %524 = vmatmul.f32.gmra.mxu1 %v433_v29  ;;  %601 = vmatmul.f32.gmra.mxu2 %v442_v38  ;;  %v283_v29 = vld [vmem:[%s1882_s17 + $0x40] sm:$0xff]  ;;  %s1370_s17 = scalar_lea.hbm %s2619_s5, %s1459_s28 }
  0xc1   : > { %1468 = vmatmul.msk.f32.gmra.mxu0 %vm297_vm0, %v283_v29  ;;  %v605_v38 = vld [vmem:[%s2616_s2] sm:$0xff]  ;;  %s1373_s25 = sshll.u32 %s1370_s17, 4  ;;  %s1374_s25 = int_to_ptr.hbm [resolvable:$true] %s1373_s25 }
  0xc2   : > { %1619 = vmatpush.msra.mxu3 %v605_v38  ;;  %670 = vmatpush.msrb.mxu2 %v605_v38  ;;  %s1692_s28 = sshra.s32 %s1374_s25, 4  ;;  %s1693_s28 = int_to_ptr.hbm [resolvable:$true] %s1692_s28 }
  0xc3   : > { %s1694_s8 = scalar_lea.hbm %s1693_s28, 128  ;;  %p1699_p4 = scmp.lt.s32.totalorder %s1693_s28, %s2619_s5 }
  0xc4   : > { %834 = vmatpush.msrb.mxu3 %v1905_v5  ;;  %1064 = vmatpush.msra.mxu2 %v1894_v3  ;;  %v1494_v5 = vld [vmem:[%s1870_s23 + $0x110] sm:$0xff]  ;;  %p1695_p1 = scmp.ne.s32.totalorder %s1693_s28, %s1694_s8  ;;  %p1700_p5 = scmp.lt.s32.totalorder %s1698_s9, %s1694_s8 }
  0xc5   : > { %v2166_v40 = vpop.f32.mrf.mxu1 }
  0xc6   : > { %835 = vmatpush.msrb.mxu3 %v1913_v6  ;;  %1065 = vmatpush.msra.mxu2 %v1900_v4  ;;  %p1696_p2 = pnand %p1695_p1, %p1831_p9  ;;  %p1701_p6 = por %p1700_p5, %p1699_p4 }
  0xc8   : > { %527 = vmatmul.f32.gmra.mxu1 %v435_v41  ;;  %836 = vmatpush.msrb.mxu3 %v1923_v8  ;;  %v1496_v8 = vld [vmem:[%s1870_s23 + $0x120] sm:$0xff]  ;;  %p1697_p3 = pneg %p1696_p2 }
  0xc9   : > { %1066 = vmatpush.msra.mxu2 %v1918_v7  ;;  %785 = vmatmul.f32.vlgmr.msrb.gmra.mxu0 %v1492_v42 }
  0xca   : > { %837 = vmatpush.msrb.mxu3 %v1936_v10  ;;  %v1498_v10 = vld [vmem:[%s1870_s23 + $0x130] sm:$0xff]  ;;  %p1702_p7 = pnand %p1701_p6, %p1697_p3 }
  0xcb   : > { %1067 = vmatpush.msra.mxu2 %v1931_v9 }
  0xcc   : > { %838 = vmatpush.msrb.mxu3 %v1950_v13 }
  0xcd   : > { %v2175_v43 = vpop.f32.mrf.mxu1  ;;  %1068 = vmatpush.msra.mxu2 %v1945_v12 }
  0xce   : > { %839 = vmatpush.msrb.mxu3 %v1964_v15  ;;  %v1500_v15 = vld [vmem:[%s1870_s23 + $0x140] sm:$0xff] }
  0xcf   : > { %1069 = vmatpush.msra.mxu2 %v1959_v14 }
  0xd0   : > { %530 = vmatmul.f32.gmra.mxu1 %v437_v44  ;;  %840 = vmatpush.msrb.mxu3 %v1977_v17  ;;  %v1510_v44 = vld [vmem:[%s1870_s23 + $0x190] sm:$0xff] }
  0xd1   : > { %1070 = vmatpush.msra.mxu2 %v1972_v16  ;;  %788 = vmatmul.f32.gmra.mxu0 %v1494_v5 }
  0xd2   : > { %841 = vmatpush.msrb.mxu3 %v1990_v19  ;;  %v1502_v19 = vld [vmem:[%s1870_s23 + $0x150] sm:$0xff] }
  0xd3   : > { %v2186_v47 = vpop.f32.mrf.mxu2  ;;  %1071 = vmatpush.msra.mxu2 %v1985_v18 }
  0xd4   : > { %842 = vmatpush.msrb.mxu3 %v2004_v22 }
  0xd5   : > { %v2189_v48 = vpop.f32.mrf.mxu1  ;;  %1072 = vmatpush.msra.mxu2 %v1999_v21 }
  0xd6   : > { %843 = vmatpush.msrb.mxu3 %v2018_v24  ;;  %v1504_v24 = vld [vmem:[%s1870_s23 + $0x160] sm:$0xff] }
  0xd7   : > { %1073 = vmatpush.msra.mxu2 %v2013_v23 }
  0xd8   : > { %533 = vmatmul.f32.gmra.mxu1 %v439_v49  ;;  %844 = vmatpush.msrb.mxu3 %v2031_v26  ;;  %v2283_v26 = vpop.f32.mrf.mxu0 }
  0xd9   : > { %1074 = vmatpush.msra.mxu2 %v2026_v25  ;;  %791 = vmatmul.f32.gmra.mxu0 %v1496_v8 }
  0xda   : > { %845 = vmatpush.msrb.mxu3 %v2044_v28 }
  0xdb   : > { %v2196_v51 = vpop.f32.mrf.mxu2  ;;  %1075 = vmatpush.msra.mxu2 %v2039_v27 }
  0xdc   : > { %846 = vmatpush.msrb.mxu3 %v2058_v31 }
  0xdd   : > { %v2199_v52 = vpop.f32.mrf.mxu1  ;;  %1076 = vmatpush.msra.mxu2 %v2053_v30  ;;  %v1506_v30 = vld [vmem:[%s1870_s23 + $0x170] sm:$0xff] }
  0xde   : > { %847 = vmatpush.msrb.mxu3 %v2072_v33 }
  0xdf   : > { %1077 = vmatpush.msra.mxu2 %v2067_v32 }
  0xe0   : > { %536 = vmatmul.f32.gmra.mxu1 %v441_v53  ;;  %848 = vmatpush.msrb.mxu3 %v2085_v35  ;;  %v2287_v32 = vpop.f32.mrf.mxu0  ;;  %v1512_v53 = vld [vmem:[%s1870_s23 + $0x1a0] sm:$0xff] }
  0xe1   : > { %1078 = vmatpush.msra.mxu2 %v2080_v34  ;;  %794 = vmatmul.f32.gmra.mxu0 %v1498_v10  ;;  %v1508_v34 = vld [vmem:[%s1870_s23 + $0x180] sm:$0xff]  ;;  %v1518_v10 = vld [vmem:[%s1870_s23 + $0x1d0] sm:$0xff] }
  0xe2   : > { %849 = vmatpush.msrb.mxu3 %v2098_v37 }
  0xe3   : > { %v2206_v55 = vpop.f32.mrf.mxu2  ;;  %1079 = vmatpush.msra.mxu2 %v2093_v36 }
  0xe5   : > { %v2208_v56 = vpop.f32.mrf.mxu1 }
  0xe8   : > { %556 = vmatmul.f32.vlgmr.msra.gmra.mxu1 %v412_v57  ;;  %v2291_v37 = vpop.f32.mrf.mxu0 }
  0xe9   : > { %797 = vmatmul.f32.gmra.mxu0 %v1500_v15  ;;  %v1497_v15 = vld [vmem:[%s1870_s23 + $0x128] sm:$0xff] }
  0xeb   : > { %v2215_v60 = vpop.f32.mrf.mxu2 }
  0xed   : > { %v2213_v59 = vpop.f32.mrf.mxu1 }
  0xf1   : > { %800 = vmatmul.f32.gmra.mxu0 %v1502_v19 }
  0xf3   : > { %v2223_v2 = vpop.f32.mrf.mxu2 }
  0xf5   : > { %v2219_v63 = vpop.f32.mrf.mxu1 }
  0xf9   : > { %803 = vmatmul.f32.gmra.mxu0 %v1504_v24 }
  0xfb   : > { %v2234_v39 = vpop.f32.mrf.mxu2 }
  0xfd   : > { %v2225_v11 = vpop.f32.mrf.mxu1 }
  0xfe   : > { %v2295_v50 = vpop.f32.mrf.mxu0 }
 0x101   : > { %806 = vmatmul.f32.gmra.mxu0 %v1506_v30  ;;  %v1542_v30 = vld [vmem:[%s1870_s23 + $0x200] sm:$0xff] }
 0x103   : > { %v578_v3 = vpop.f32.mrf.mxu2 }
 0x105   : > { %v2240_v41 = vpop.f32.mrf.mxu1 }
 0x109   : > { %809 = vmatmul.f32.gmra.mxu0 %v1508_v34  ;;  %v1544_v34 = vld [vmem:[%s1870_s23 + $0x210] sm:$0xff] }
 0x10b   : > { %v581_v7 = vpop.f32.mrf.mxu2 }
 0x10d   : > { %v2250_v4 = vpop.f32.mrf.mxu1 }
 0x10e   : > { %v2299_v61 = vpop.f32.mrf.mxu0  ;;  %v573_v24 = vadd.f32 %v2223_v2, %v2250_v4  ;;  %v1549_v2 = vld [vmem:[%s1870_s23 + $0x238] sm:$0xff] }
 0x10f   : > { %v1507_v4 = vld [vmem:[%s1870_s23 + $0x178] sm:$0xff] }
 0x111   : > { %812 = vmatmul.f32.gmra.mxu0 %v1510_v44  ;;  %v1553_v44 = vld [vmem:[%s1870_s23 + $0x258] sm:$0xff] }
 0x113   : > { %v584_v13 = vpop.f32.mrf.mxu2 }
 0x115   : > { %v2261_v6 = vpop.f32.mrf.mxu1 }
 0x119   : > { %815 = vmatmul.f32.gmra.mxu0 %v1512_v53 }
 0x11b   : > { %v587_v17 = vpop.f32.mrf.mxu2 }
 0x11d   : > { %v513_v9 = vpop.f32.mrf.mxu1 }
 0x11e   : > { %v579_v12 = vadd.f32 %v578_v3, %v513_v9  ;;  %v2303_v42 = vpop.f32.mrf.mxu0  ;;  %v1516_v3 = vld [vmem:[%s1870_s23 + $0x1c0] sm:$0xff] }
 0x120   : > { %1483 = vmatmul.msk.f32.vlgmr.msra.gmra.mxu3 %vm297_vm0, %v579_v12  ;;  %v1495_v12 = vld [vmem:[%s1870_s23 + $0x118] sm:$0xff] }
 0x121   : > { %818 = vmatmul.f32.gmra.mxu0 %v1514_v0 }
 0x123   : > { %v590_v22 = vpop.f32.mrf.mxu2 }
 0x125   : > { %v516_v14 = vpop.f32.mrf.mxu1 }
 0x126   : > { %v582_v16 = vadd.f32 %v581_v7, %v516_v14  ;;  %v1493_v7 = vld [vmem:[%s1870_s23 + $0x108] sm:$0xff]  ;;  %v2309_v9 = vpop.f32.mrf.mxu0 }
 0x128   : > { %1484 = vmatmul.msk.f32.gmra.mxu3 %vm297_vm0, %v582_v16  ;;  %v564_v16 = vadd.f32 %v2196_v51, %v2219_v63  ;;  %v1543_v51 = vld [vmem:[%s1870_s23 + $0x208] sm:$0xff] }
 0x129   : > { %821 = vmatmul.f32.gmra.mxu0 %v1516_v3  ;;  %v1575_v63 = vld [vmem:[%s2616_s2 + $0x28] sm:$0xff]  ;;  %v1515_v3 = vld [vmem:[%s1870_s23 + $0x1b8] sm:$0xff] }
 0x12a   : > { %1259 = vmatpush.msra.mxu3 %v1575_v63  ;;  %v1561_v63 = vld [vmem:[%s1870_s23 + $0x298] sm:$0xff] }
 0x12b   : > { %v593_v28 = vpop.f32.mrf.mxu2 }
 0x12d   : > { %v519_v18 = vpop.f32.mrf.mxu1 }
 0x12e   : > { %v585_v21 = vadd.f32 %v584_v13, %v519_v18  ;;  %v561_v13 = vadd.f32 %v2186_v47, %v2213_v59  ;;  %v2316_v14 = vpop.f32.mrf.mxu0  ;;  %v1522_v47 = vld [vmem:[%s1870_s23 + $0x1f0] sm:$0xff]  ;;  %v1499_v59 = vld [vmem:[%s1870_s23 + $0x138] sm:$0xff]  ;;  %v567_v18 = vadd.f32 %v2206_v55, %v2225_v11 }
 0x12f   : > { %v1545_v11 = vld [vmem:[%s1870_s23 + $0x218] sm:$0xff] }
 0x130   : > { %1485 = vmatmul.msk.f32.gmra.mxu3 %vm297_vm0, %v585_v21  ;;  %v1501_v21 = vld [vmem:[%s1870_s23 + $0x148] sm:$0xff] }
 0x131   : > { %824 = vmatmul.f32.gmra.mxu0 %v1518_v10  ;;  %v1559_v10 = vld [vmem:[%s1870_s23 + $0x288] sm:$0xff] }
 0x133   : > { %v596_v36 = vpop.f32.mrf.mxu2 }
 0x135   : > { %v522_v23 = vpop.f32.mrf.mxu1 }
 0x136   : > { %v588_v25 = vadd.f32 %v587_v17, %v522_v23  ;;  %v1503_v23 = vld [vmem:[%s1870_s23 + $0x158] sm:$0xff] }
 0x138   : > { %1486 = vmatmul.msk.f32.gmra.mxu3 %vm297_vm0, %v588_v25 }
 0x13b   : > { %v599_v49 = vpop.f32.mrf.mxu2 }
 0x13d   : > { %v525_v27 = vpop.f32.mrf.mxu1 }
 0x13e   : > { %v591_v31 = vadd.f32 %v590_v22, %v525_v27  ;;  %v2323_v17 = vpop.f32.mrf.mxu0  ;;  %v570_v22 = vadd.f32 %v2215_v60, %v2240_v41  ;;  %v1547_v60 = vld [vmem:[%s1870_s23 + $0x228] sm:$0xff]  ;;  %v576_v27 = vadd.f32 %v2234_v39, %v2261_v6 }
 0x13f   : > { %v1505_v41 = vld [vmem:[%s1870_s23 + $0x168] sm:$0xff] }
 0x140   : > { %1487 = vmatmul.msk.f32.gmra.mxu3 %vm297_vm0, %v591_v31  ;;  %v1551_v39 = vld [vmem:[%s1870_s23 + $0x248] sm:$0xff] }
 0x141   : > { %v1509_v6 = vld [vmem:[%s1870_s23 + $0x188] sm:$0xff] }
 0x143   : > { %v602_v58 = vpop.f32.mrf.mxu2 }
 0x145   : > { %v528_v33 = vpop.f32.mrf.mxu1 }
 0x146   : > { %v594_v35 = vadd.f32 %v593_v28, %v528_v33  ;;  %v2330_v19 = vpop.f32.mrf.mxu0 }
 0x148   : > { %1488 = vmatmul.msk.f32.gmra.mxu3 %vm297_vm0, %v594_v35 }
 0x14d   : > { %v531_v45 = vpop.f32.mrf.mxu1 }
 0x14e   : > { %v597_v46 = vadd.f32 %v596_v36, %v531_v45  ;;  %v2340_v55 = vpop.f32.mrf.mxu0  ;;  %v1511_v45 = vld [vmem:[%s1870_s23 + $0x198] sm:$0xff] }
 0x150   : > { %1489 = vmatmul.msk.f32.gmra.mxu3 %vm297_vm0, %v597_v46  ;;  %v1546_v46 = vld [vmem:[%s1870_s23 + $0x220] sm:$0xff] }
 0x155   : > { %v534_v54 = vpop.f32.mrf.mxu1 }
 0x156   : > { %v600_v57 = vadd.f32 %v599_v49, %v534_v54  ;;  %v2347_v25 = vpop.f32.mrf.mxu0  ;;  %v1555_v54 = vld [vmem:[%s1870_s23 + $0x268] sm:$0xff] }
 0x158   : > { %1490 = vmatmul.msk.f32.gmra.mxu3 %vm297_vm0, %v600_v57  ;;  %v1513_v57 = vld [vmem:[%s1870_s23 + $0x1a8] sm:$0xff] }
 0x15d   : > { %v537_v29 = vpop.f32.mrf.mxu1 }
 0x15e   : > { %v603_v38 = vadd.f32 %v602_v58, %v537_v29  ;;  %v2354_v28 = vpop.f32.mrf.mxu0  ;;  %v1548_v58 = vld [vmem:[%s1870_s23 + $0x230] sm:$0xff] }
 0x160   : > { %1491 = vmatmul.msk.f32.gmra.mxu3 %vm297_vm0, %v603_v38  ;;  %v1557_v38 = vld [vmem:[%s1870_s23 + $0x278] sm:$0xff] }
 0x165   : > { %v557_v5 = vpop.f32.mrf.mxu1 }
 0x166   : > { %v558_v8 = vadd.f32 %v557_v5, %v2208_v56  ;;  %v1520_v56 = vld [vmem:[%s1870_s23 + $0x1e0] sm:$0xff]  ;;  %v2361_v33 = vpop.f32.mrf.mxu0 }
 0x167   : > { %827 = vmatmul.f32.gmra.mxu0 %v1520_v56  ;;  %v1550_v5 = vld [vmem:[%s1870_s23 + $0x240] sm:$0xff]  ;;  %v1552_v56 = vld [vmem:[%s1870_s23 + $0x250] sm:$0xff] }
 0x168   : > { %1476 = vmatmul.msk.f32.vlgmr.msrb.gmra.mxu2 %vm297_vm0, %v558_v8  ;;  %850 = vmatmul.f32.vlgmr.msrb.gmra.mxu3 %v1493_v7 }
 0x16e   : > { %v2368_v36 = vpop.f32.mrf.mxu0 }
 0x16f   : > { %830 = vmatmul.f32.gmra.mxu0 %v1522_v47 }
 0x170   : > { %1477 = vmatmul.msk.f32.gmra.mxu2 %vm297_vm0, %v561_v13  ;;  %853 = vmatmul.f32.gmra.mxu3 %v1495_v12  ;;  %v1574_v12 = vld [vmem:[%s2616_s2 + $0x20] sm:$0xff]  ;;  %v1517_v13 = vld [vmem:[%s1870_s23 + $0x1c8] sm:$0xff] }
 0x171   : > { %1260 = vmatpush.msra.mxu3 %v1574_v12  ;;  %v1564_v12 = vld [vmem:[%s1870_s23 + $0x2b0] sm:$0xff] }
 0x176   : > { %v2375_v53 = vpop.f32.mrf.mxu0 }
 0x177   : > { %1145 = vmatmul.f32.vlgmr.msra.gmra.mxu0 %v1543_v51  ;;  %v1554_v51 = vld [vmem:[%s1870_s23 + $0x260] sm:$0xff] }
 0x178   : > { %1478 = vmatmul.msk.f32.gmra.mxu2 %vm297_vm0, %v564_v16  ;;  %856 = vmatmul.f32.gmra.mxu3 %v1497_v15  ;;  %v1525_v15 = vld [vmem:[%s2616_s2 + $0x18] sm:$0xff] }
 0x179   : > { %964 = vmatpush.msrb.mxu1 %v1525_v15 }
 0x17e   : > { %v2382_v29 = vpop.f32.mrf.mxu0 }
 0x17f   : > { %1148 = vmatmul.f32.gmra.mxu0 %v1545_v11  ;;  %v1521_v11 = vld [vmem:[%s1870_s23 + $0x1e8] sm:$0xff] }
 0x180   : > { %1479 = vmatmul.msk.f32.gmra.mxu2 %vm297_vm0, %v567_v18  ;;  %859 = vmatmul.f32.gmra.mxu3 %v1499_v59  ;;  %v1524_v59 = vld [vmem:[%s2616_s2 + $0x10] sm:$0xff]  ;;  %v1519_v18 = vld [vmem:[%s1870_s23 + $0x1d8] sm:$0xff] }
 0x181   : > { %965 = vmatpush.msrb.mxu1 %v1524_v59 }
 0x186   : > { %v2389_v8 = vpop.f32.mrf.mxu0 }
 0x187   : > { %1151 = vmatmul.f32.gmra.mxu0 %v1547_v60 }
 0x188   : > { %1480 = vmatmul.msk.f32.gmra.mxu2 %vm297_vm0, %v570_v22  ;;  %862 = vmatmul.f32.gmra.mxu3 %v1501_v21 }
 0x18e   : > { %v2402_v47 = vpop.f32.mrf.mxu0 }
 0x18f   : > { %1154 = vmatmul.f32.gmra.mxu0 %v1549_v2  ;;  %v1558_v2 = vld [vmem:[%s1870_s23 + $0x280] sm:$0xff] }
 0x190   : > { %1481 = vmatmul.msk.f32.gmra.mxu2 %vm297_vm0, %v573_v24  ;;  %865 = vmatmul.f32.gmra.mxu3 %v1503_v23  ;;  %v1556_v23 = vld [vmem:[%s1870_s23 + $0x270] sm:$0xff]  ;;  %v1563_v24 = vld [vmem:[%s1870_s23 + $0x2a8] sm:$0xff] }
 0x196   : > { %v2412_v22 = vpop.f32.mrf.mxu0 }
 0x197   : > { %1157 = vmatmul.f32.gmra.mxu0 %v1551_v39 }
 0x198   : > { %1482 = vmatmul.msk.f32.gmra.mxu2 %vm297_vm0, %v576_v27  ;;  %868 = vmatmul.f32.gmra.mxu3 %v1505_v41  ;;  %v1523_v27 = vld [vmem:[%s1870_s23 + $0x1f8] sm:$0xff] }
 0x19e   : > { %v2419_v41 = vpop.f32.mrf.mxu0 }
 0x19f   : > { %1160 = vmatmul.f32.gmra.mxu0 %v1553_v44 }
 0x1a0   : > { %871 = vmatmul.f32.gmra.mxu3 %v1507_v4  ;;  %1080 = vmatmul.f32.vlgmr.msra.gmra.mxu2 %v1542_v30  ;;  %v1565_v4 = vld [vmem:[%s1870_s23 + $0x2b8] sm:$0xff] }
 0x1a3   : > { %v2359_v31 = vpop.f32.mrf.mxu3 }
 0x1a6   : > { %v2426_v39 = vpop.f32.mrf.mxu0 }
 0x1a7   : > { %1163 = vmatmul.f32.gmra.mxu0 %v1555_v54 }
 0x1a8   : > { %874 = vmatmul.f32.gmra.mxu3 %v1509_v6  ;;  %1083 = vmatmul.f32.gmra.mxu2 %v1544_v34  ;;  %v1560_v6 = vld [vmem:[%s1870_s23 + $0x290] sm:$0xff]  ;;  %v1567_v34 = vld [vmem:[%s1870_s23 + $0x2c8] sm:$0xff] }
 0x1ab   : > { %v2366_v35 = vpop.f32.mrf.mxu3 }
 0x1ae   : > { %v2433_v54 = vpop.f32.mrf.mxu0 }
 0x1af   : > { %1166 = vmatmul.f32.gmra.mxu0 %v1557_v38 }
 0x1b0   : > { %877 = vmatmul.f32.gmra.mxu3 %v1511_v45  ;;  %1086 = vmatmul.f32.gmra.mxu2 %v1546_v46 }
 0x1b3   : > { %v2373_v49 = vpop.f32.mrf.mxu3 }
 0x1b7   : > { %1169 = vmatmul.f32.gmra.mxu0 %v1559_v10 }
 0x1b8   : > { %880 = vmatmul.f32.gmra.mxu3 %v1513_v57  ;;  %1089 = vmatmul.f32.gmra.mxu2 %v1548_v58  ;;  %v1562_v57 = vld [vmem:[%s1870_s23 + $0x2a0] sm:$0xff]  ;;  %v1569_v58 = vld [vmem:[%s1870_s23 + $0x2d8] sm:$0xff] }
 0x1bb   : > { %v2380_v0 = vpop.f32.mrf.mxu3 }
 0x1bf   : > { %1172 = vmatmul.f32.gmra.mxu0 %v1561_v63 }
 0x1c0   : > { %883 = vmatmul.f32.gmra.mxu3 %v1515_v3  ;;  %1092 = vmatmul.f32.gmra.mxu2 %v1550_v5 }
 0x1c3   : > { %v2387_v7 = vpop.f32.mrf.mxu3 }
 0x1c7   : > { %1175 = vmatmul.f32.gmra.mxu0 %v1563_v24  ;;  %v1568_v24 = vld [vmem:[%s1870_s23 + $0x2d0] sm:$0xff] }
 0x1c8   : > { %886 = vmatmul.f32.gmra.mxu3 %v1517_v13  ;;  %1095 = vmatmul.f32.gmra.mxu2 %v1552_v56  ;;  %v1571_v13 = vld [vmem:[%s1870_s23 + $0x2e8] sm:$0xff] }
 0x1cb   : > { %v2400_v16 = vpop.f32.mrf.mxu3 }
 0x1cf   : > { %1178 = vmatmul.f32.gmra.mxu0 %v1565_v4 }
 0x1d0   : > { %889 = vmatmul.f32.gmra.mxu3 %v1519_v18  ;;  %1098 = vmatmul.f32.gmra.mxu2 %v1554_v51  ;;  %v1566_v18 = vld [vmem:[%s1870_s23 + $0x2c0] sm:$0xff]  ;;  %v1573_v51 = vld [vmem:[%s1870_s23 + $0x2f8] sm:$0xff] }
 0x1d3   : > { %v2410_v21 = vpop.f32.mrf.mxu3 }
 0x1d7   : > { %1181 = vmatmul.f32.gmra.mxu0 %v1567_v34 }
 0x1d8   : > { %892 = vmatmul.f32.gmra.mxu3 %v1521_v11  ;;  %1101 = vmatmul.f32.gmra.mxu2 %v1556_v23 }
 0x1db   : > { %v2417_v60 = vpop.f32.mrf.mxu3 }
 0x1df   : > { %1184 = vmatmul.f32.gmra.mxu0 %v1569_v58 }
 0x1e0   : > { %895 = vmatmul.f32.gmra.mxu3 %v1523_v27  ;;  %1104 = vmatmul.f32.gmra.mxu2 %v1558_v2 }
 0x1e3   : > { %v2424_v30 = vpop.f32.mrf.mxu3 }
 0x1e4   : > { %v2441_v10 = vpop.f32.mrf.mxu0 }
 0x1e7   : > { %1187 = vmatmul.f32.gmra.mxu0 %v1571_v13 }
 0x1e8   : > { %1107 = vmatmul.f32.gmra.mxu2 %v1560_v6  ;;  %v1570_v6 = vld [vmem:[%s1870_s23 + $0x2e0] sm:$0xff] }
 0x1eb   : > { %v2430_v44 = vpop.f32.mrf.mxu2  ;;  %v851_v45 = vpop.f32.mrf.mxu3 }
 0x1ec   : > { %v852_v46 = vadd.f32 %v851_v45, %v2330_v19  ;;  %v2449_v59 = vpop.f32.mrf.mxu0 }
 0x1ee   : > { %1526 = vmatmul.msk.f32.vlgmr.msrb.gmra.mxu1 %vm297_vm0, %v852_v46  ;;  %v1572_v46 = vld [vmem:[%s1870_s23 + $0x2f0] sm:$0xff] }
 0x1ef   : > { %1190 = vmatmul.f32.gmra.mxu0 %v1573_v51 }
 0x1f0   : > { %1110 = vmatmul.f32.gmra.mxu2 %v1562_v57 }
 0x1f3   : > { %v2438_v38 = vpop.f32.mrf.mxu2  ;;  %v854_v3 = vpop.f32.mrf.mxu3 }
 0x1f4   : > { %v855_v5 = vadd.f32 %v854_v3, %v2340_v55  ;;  %v1146_v23 = vpop.f32.mrf.mxu0 }
 0x1f6   : > { %1527 = vmatmul.msk.f32.gmra.mxu1 %vm297_vm0, %v855_v5 }
 0x1f8   : > { %1113 = vmatmul.f32.gmra.mxu2 %v1564_v12 }
 0x1fb   : > { %v2446_v19 = vpop.f32.mrf.mxu2  ;;  %v857_v56 = vpop.f32.mrf.mxu3 }
 0x1fc   : > { %v858_v15 = vadd.f32 %v857_v56, %v2347_v25  ;;  %v1149_v4 = vpop.f32.mrf.mxu0 }
 0x1fe   : > { %1528 = vmatmul.msk.f32.gmra.mxu1 %vm297_vm0, %v858_v15 }
 0x200   : > { %1116 = vmatmul.f32.gmra.mxu2 %v1566_v18 }
 0x203   : > { %v2454_v55 = vpop.f32.mrf.mxu2  ;;  %v860_v63 = vpop.f32.mrf.mxu3 }
 0x204   : > { %v861_v11 = vadd.f32 %v860_v63, %v2354_v28  ;;  %v1152_v57 = vpop.f32.mrf.mxu0 }
 0x206   : > { %1529 = vmatmul.msk.f32.gmra.mxu1 %vm297_vm0, %v861_v11 }
 0x208   : > { %1119 = vmatmul.f32.gmra.mxu2 %v1568_v24 }
 0x20b   : > { %v2459_v25 = vpop.f32.mrf.mxu2  ;;  %v863_v27 = vpop.f32.mrf.mxu3 }
 0x20c   : > { %v864_v2 = vadd.f32 %v863_v27, %v2361_v33  ;;  %v1155_v5 = vpop.f32.mrf.mxu0 }
 0x20e   : > { %1530 = vmatmul.msk.f32.gmra.mxu1 %vm297_vm0, %v864_v2 }
 0x210   : > { %1122 = vmatmul.f32.gmra.mxu2 %v1570_v6 }
 0x213   : > { %v2464_v34 = vpop.f32.mrf.mxu2  ;;  %v866_v45 = vpop.f32.mrf.mxu3 }
 0x214   : > { %v867_v28 = vadd.f32 %v866_v45, %v2368_v36  ;;  %v1158_v36 = vpop.f32.mrf.mxu0 }
 0x216   : > { %1531 = vmatmul.msk.f32.gmra.mxu1 %vm297_vm0, %v867_v28 }
 0x218   : > { %1125 = vmatmul.f32.gmra.mxu2 %v1572_v46 }
 0x21b   : > { %v2469_v58 = vpop.f32.mrf.mxu2  ;;  %v869_v3 = vpop.f32.mrf.mxu3 }
 0x21c   : > { %v870_v33 = vadd.f32 %v869_v3, %v2375_v53 }
 0x21e   : > { %1532 = vmatmul.msk.f32.gmra.mxu1 %vm297_vm0, %v870_v33 }
 0x223   : > { %v872_v12 = vpop.f32.mrf.mxu3  ;;  %v1081_v13 = vpop.f32.mrf.mxu2 }
 0x224   : > { %v873_v56 = vadd.f32 %v872_v12, %v2382_v29  ;;  %v1147_v15 = vadd.f32 %v1146_v23, %v1081_v13  ;;  %v1161_v23 = vpop.f32.mrf.mxu0 }
 0x226   : > { %1533 = vmatmul.msk.f32.gmra.mxu1 %vm297_vm0, %v873_v56  ;;  %1576 = vmatmul.msk.f32.vlgmr.msra.gmra.mxu3 %vm297_vm0, %v1147_v15 }
 0x22b   : > { %v875_v18 = vpop.f32.mrf.mxu3  ;;  %v1084_v51 = vpop.f32.mrf.mxu2 }
 0x22c   : > { %v876_v63 = vadd.f32 %v875_v18, %v2389_v8  ;;  %v1150_v11 = vadd.f32 %v1149_v4, %v1084_v51  ;;  %v1164_v4 = vpop.f32.mrf.mxu0 }
 0x22e   : > { %1534 = vmatmul.msk.f32.gmra.mxu1 %vm297_vm0, %v876_v63  ;;  %1577 = vmatmul.msk.f32.gmra.mxu3 %vm297_vm0, %v1150_v11 }
 0x233   : > { %v878_v53 = vpop.f32.mrf.mxu3  ;;  %v1087_v24 = vpop.f32.mrf.mxu2 }
 0x234   : > { %v879_v27 = vadd.f32 %v878_v53, %v2402_v47  ;;  %v1153_v29 = vadd.f32 %v1152_v57, %v1087_v24  ;;  %v1167_v3 = vpop.f32.mrf.mxu0 }
 0x236   : > { %1535 = vmatmul.msk.f32.gmra.mxu1 %vm297_vm0, %v879_v27  ;;  %1578 = vmatmul.msk.f32.gmra.mxu3 %vm297_vm0, %v1153_v29 }
 0x23b   : > { %v881_v2 = vpop.f32.mrf.mxu3  ;;  %v1090_v6 = vpop.f32.mrf.mxu2 }
 0x23c   : > { %v882_v45 = vadd.f32 %v881_v2, %v2412_v22  ;;  %v1156_v8 = vadd.f32 %v1155_v5, %v1090_v6  ;;  %v1170_v13 = vpop.f32.mrf.mxu0 }
 0x23e   : > { %1536 = vmatmul.msk.f32.gmra.mxu1 %vm297_vm0, %v882_v45  ;;  %1579 = vmatmul.msk.f32.gmra.mxu3 %vm297_vm0, %v1156_v8 }
 0x243   : > { %v884_v28 = vpop.f32.mrf.mxu3  ;;  %v1093_v46 = vpop.f32.mrf.mxu2 }
 0x244   : > { %v885_v47 = vadd.f32 %v884_v28, %v2419_v41  ;;  %v1159_v57 = vadd.f32 %v1158_v36, %v1093_v46  ;;  %v1173_v11 = vpop.f32.mrf.mxu0 }
 0x246   : > { %1537 = vmatmul.msk.f32.gmra.mxu1 %vm297_vm0, %v885_v47  ;;  %1580 = vmatmul.msk.f32.gmra.mxu3 %vm297_vm0, %v1159_v57 }
 0x24b   : > { %v887_v33 = vpop.f32.mrf.mxu3  ;;  %v1096_v12 = vpop.f32.mrf.mxu2 }
 0x24c   : > { %v888_v22 = vadd.f32 %v887_v33, %v2426_v39  ;;  %v1162_v5 = vadd.f32 %v1161_v23, %v1096_v12  ;;  %v1176_v29 = vpop.f32.mrf.mxu0 }
 0x24e   : > { %1538 = vmatmul.msk.f32.gmra.mxu1 %vm297_vm0, %v888_v22  ;;  %1581 = vmatmul.msk.f32.gmra.mxu3 %vm297_vm0, %v1162_v5 }
 0x253   : > { %v890_v56 = vpop.f32.mrf.mxu3  ;;  %v1099_v15 = vpop.f32.mrf.mxu2 }
 0x254   : > { %v891_v41 = vadd.f32 %v890_v56, %v2433_v54  ;;  %v1165_v36 = vadd.f32 %v1164_v4, %v1099_v15 }
 0x256   : > { %1539 = vmatmul.msk.f32.gmra.mxu1 %vm297_vm0, %v891_v41  ;;  %1582 = vmatmul.msk.f32.gmra.mxu3 %vm297_vm0, %v1165_v36 }
 0x25b   : > { %v893_v18 = vpop.f32.mrf.mxu3  ;;  %v1102_v51 = vpop.f32.mrf.mxu2 }
 0x25c   : > { %v894_v63 = vadd.f32 %v893_v18, %v2441_v10  ;;  %v1168_v39 = vadd.f32 %v1167_v3, %v1102_v51  ;;  %v1179_v10 = vpop.f32.mrf.mxu0  ;;  %v2510_v18 = vld [vmem:[%s2618_s4] ss:$0 sm:$0xff] }
 0x25d   : > { %v364_v51 = vadd.f32 %v2510_v18, %v2283_v26 }
 0x25e   : > { %1540 = vmatmul.msk.f32.gmra.mxu1 %vm297_vm0, %v894_v63  ;;  %1583 = vmatmul.msk.f32.gmra.mxu3 %vm297_vm0, %v1168_v39 }
 0x25f   : > { %v720_v39 = vadd.f32 %v2430_v44, %v364_v51 }
 0x263   : > { %v896_v53 = vpop.f32.mrf.mxu3  ;;  %v1105_v24 = vpop.f32.mrf.mxu2 }
 0x264   : > { %v897_v27 = vadd.f32 %v896_v53, %v2449_v59  ;;  %v1171_v54 = vadd.f32 %v1170_v13, %v1105_v24  ;;  %v1182_v4 = vpop.f32.mrf.mxu0 }
 0x266   : > { %1541 = vmatmul.msk.f32.gmra.mxu1 %vm297_vm0, %v897_v27  ;;  %1584 = vmatmul.msk.f32.gmra.mxu3 %vm297_vm0, %v1171_v54  ;;  %v367_v27 = vadd.f32 %v2510_v18, %v2287_v32 }
 0x26b   : > { %v1108_v23 = vpop.f32.mrf.mxu2  ;;  %v967_v57 = vpop.f32.mrf.mxu1 }
 0x26c   : > { %v1174_v2 = vadd.f32 %v1173_v11, %v1108_v23  ;;  %v1185_v47 = vpop.f32.mrf.mxu0  ;;  %v1015_v11 = vadd.f32 %v967_v57, %v720_v39 }
 0x26e   : > { %1585 = vmatmul.msk.f32.gmra.mxu3 %vm297_vm0, %v1174_v2 }
 0x273   : > { %v1111_v6 = vpop.f32.mrf.mxu2  ;;  %v970_v22 = vpop.f32.mrf.mxu1 }
 0x274   : > { %v1177_v45 = vadd.f32 %v1176_v29, %v1111_v6  ;;  %v1188_v12 = vpop.f32.mrf.mxu0  ;;  %v721_v29 = vadd.f32 %v2438_v38, %v367_v27 }
 0x276   : > { %1586 = vmatmul.msk.f32.gmra.mxu3 %vm297_vm0, %v1177_v45  ;;  %v1016_v23 = vadd.f32 %v970_v22, %v721_v29 }
 0x27b   : > { %v1114_v8 = vpop.f32.mrf.mxu2  ;;  %v973_v15 = vpop.f32.mrf.mxu1 }
 0x27c   : > { %v1180_v28 = vadd.f32 %v1179_v10, %v1114_v8  ;;  %v1191_v56 = vpop.f32.mrf.mxu0  ;;  %v370_v10 = vadd.f32 %v2510_v18, %v2291_v37 }
 0x27e   : > { %1587 = vmatmul.msk.f32.gmra.mxu3 %vm297_vm0, %v1180_v28  ;;  %v722_v45 = vadd.f32 %v2446_v19, %v370_v10  ;;  %v373_v28 = vadd.f32 %v2510_v18, %v2295_v50  ;;  %v376_v19 = vadd.f32 %v2510_v18, %v2299_v61 }
 0x280   : > { %v1017_v32 = vadd.f32 %v973_v15, %v722_v45 }
 0x283   : > { %v1117_v59 = vpop.f32.mrf.mxu2  ;;  %v976_v63 = vpop.f32.mrf.mxu1 }
 0x284   : > { %v1183_v46 = vadd.f32 %v1182_v4, %v1117_v59 }
 0x286   : > { %1588 = vmatmul.msk.f32.gmra.mxu3 %vm297_vm0, %v1183_v46  ;;  %v723_v46 = vadd.f32 %v2454_v55, %v373_v28  ;;  %v379_v55 = vadd.f32 %v2510_v18, %v2303_v42 }
 0x288   : > { %v725_v15 = vadd.f32 %v2464_v34, %v379_v55  ;;  %v385_v34 = vadd.f32 %v2510_v18, %v2316_v14 }
 0x28a   : > { %v727_v27 = vadd.f32 %v2359_v31, %v385_v34  ;;  %v391_v31 = vadd.f32 %v2510_v18, %v2149_v62 }
 0x28b   : > { %v1120_v3 = vpop.f32.mrf.mxu2  ;;  %v979_v26 = vpop.f32.mrf.mxu1 }
 0x28c   : > { %v1186_v33 = vadd.f32 %v1185_v47, %v1120_v3  ;;  %v1018_v47 = vadd.f32 %v976_v63, %v723_v46 }
 0x28e   : > { %1589 = vmatmul.msk.f32.gmra.mxu3 %vm297_vm0, %v1186_v33 }
 0x293   : > { %v1123_v5 = vpop.f32.mrf.mxu2  ;;  %v982_v38 = vpop.f32.mrf.mxu1 }
 0x294   : > { %v1189_v13 = vadd.f32 %v1188_v12, %v1123_v5  ;;  %v724_v12 = vadd.f32 %v2459_v25, %v376_v19  ;;  %v382_v25 = vadd.f32 %v2510_v18, %v2309_v9 }
 0x296   : > { %1590 = vmatmul.msk.f32.gmra.mxu3 %vm297_vm0, %v1189_v13  ;;  %v1019_v22 = vadd.f32 %v979_v26, %v724_v12  ;;  %v726_v63 = vadd.f32 %v2469_v58, %v382_v25  ;;  %v388_v58 = vadd.f32 %v2510_v18, %v2323_v17 }
 0x29b   : > { %v1126_v41 = vpop.f32.mrf.mxu2  ;;  %v985_v3 = vpop.f32.mrf.mxu1 }
 0x29c   : > { %v1192_v36 = vadd.f32 %v1191_v56, %v1126_v41  ;;  %v1020_v41 = vadd.f32 %v982_v38, %v725_v15 }
 0x29e   : > { %1591 = vmatmul.msk.f32.gmra.mxu3 %vm297_vm0, %v1192_v36 }
 0x2a3   : > { %v988_v56 = vpop.f32.mrf.mxu1 }
 0x2a9   : > { %v1262_v53 = vpop.f32.mrf.mxu3 }
 0x2aa   : > { %v1310_v24 = vadd.f32 %v1262_v53, %v1015_v11  ;;  %v1021_v11 = vadd.f32 %v985_v3, %v726_v63 }
 0x2ab   : > { %v991_v39 = vpop.f32.mrf.mxu1 }
 0x2ac   : > { %v1326_v54 = vmax.f32 %v1310_v24, 0.0 }
 0x2ae   : > { %1342 = vst [vmem:[%s2519_s16] sm:$0xff] %v1326_v54  ;;  %v1022_v54 = vadd.f32 %v988_v56, %v727_v27 }
 0x2b1   : > { %v1265_v2 = vpop.f32.mrf.mxu3 }
 0x2b2   : > { %v1311_v44 = vadd.f32 %v1265_v2, %v1016_v23  ;;  %v728_v2 = vadd.f32 %v2366_v35, %v388_v58  ;;  %v394_v35 = vadd.f32 %v2510_v18, %v2153_v1 }
 0x2b3   : > { %v994_v29 = vpop.f32.mrf.mxu1 }
 0x2b4   : > { %v1327_v6 = vmax.f32 %v1311_v44, 0.0  ;;  %v1023_v44 = vadd.f32 %v991_v39, %v728_v2 }
 0x2b6   : > { %1343 = vst [vmem:[%s2519_s16 + $0x8] sm:$0xff] %v1327_v6 }
 0x2b9   : > { %v1268_v8 = vpop.f32.mrf.mxu3 }
 0x2ba   : > { %v1312_v4 = vadd.f32 %v1268_v8, %v1017_v32  ;;  %v729_v32 = vadd.f32 %v2373_v49, %v391_v31  ;;  %v397_v49 = vadd.f32 %v2510_v18, %v2157_v20 }
 0x2bb   : > { %v997_v6 = vpop.f32.mrf.mxu1 }
 0x2bc   : > { %v1328_v59 = vmax.f32 %v1312_v4, 0.0  ;;  %v1024_v38 = vadd.f32 %v994_v29, %v729_v32 }
 0x2be   : > { %1344 = vst [vmem:[%s2519_s16 + $0x10] sm:$0xff] %v1328_v59  ;;  %v730_v59 = vadd.f32 %v2380_v0, %v394_v35  ;;  %v400_v0 = vadd.f32 %v2510_v18, %v2166_v40 }
 0x2c0   : > { %v1025_v46 = vadd.f32 %v997_v6, %v730_v59 }
 0x2c1   : > { %v1271_v57 = vpop.f32.mrf.mxu3 }
 0x2c2   : > { %v1313_v37 = vadd.f32 %v1271_v57, %v1018_v47 }
 0x2c3   : > { %v1000_v28 = vpop.f32.mrf.mxu1 }
 0x2c4   : > { %v1329_v33 = vmax.f32 %v1313_v37, 0.0  ;;  %v731_v37 = vadd.f32 %v2387_v7, %v397_v49  ;;  %v403_v7 = vadd.f32 %v2510_v18, %v2175_v43 }
 0x2c6   : > { %1345 = vst [vmem:[%s2519_s16 + $0x18] sm:$0xff] %v1329_v33  ;;  %v1026_v19 = vadd.f32 %v1000_v28, %v731_v37  ;;  %v733_v56 = vadd.f32 %v2410_v21, %v403_v7  ;;  %v409_v21 = vadd.f32 %v2510_v18, %v2199_v52 }
 0x2c9   : > { %v1274_v5 = vpop.f32.mrf.mxu3 }
 0x2ca   : > { %v1314_v50 = vadd.f32 %v1274_v5, %v1019_v22  ;;  %v732_v22 = vadd.f32 %v2400_v16, %v400_v0  ;;  %v406_v16 = vadd.f32 %v2510_v18, %v2189_v48  ;;  %v735_v48 = vadd.f32 %v2424_v30, %v409_v21 }
 0x2cb   : > { %v1003_v3 = vpop.f32.mrf.mxu1 }
 0x2cc   : > { %v1330_v13 = vmax.f32 %v1314_v50, 0.0  ;;  %v1027_v5 = vadd.f32 %v1003_v3, %v732_v22  ;;  %v734_v25 = vadd.f32 %v2417_v60, %v406_v16 }
 0x2ce   : > { %1346 = vst [vmem:[%s2519_s16 + $0x20] sm:$0xff] %v1330_v13 }
 0x2d1   : > { %v1277_v36 = vpop.f32.mrf.mxu3 }
 0x2d2   : > { %v1315_v61 = vadd.f32 %v1277_v36, %v1020_v41 }
 0x2d3   : > { %v1006_v50 = vpop.f32.mrf.mxu1 }
 0x2d4   : > { %v1331_v51 = vmax.f32 %v1315_v61, 0.0  ;;  %v1028_v15 = vadd.f32 %v1006_v50, %v733_v56 }
 0x2d6   : > { %1347 = vst [vmem:[%s2519_s16 + $0x28] sm:$0xff] %v1331_v51 }
 0x2d9   : > { %v1280_v42 = vpop.f32.mrf.mxu3 }
 0x2da   : > { %v1316_v53 = vadd.f32 %v1280_v42, %v1021_v11 }
 0x2db   : > { %v1009_v36 = vpop.f32.mrf.mxu1 }
 0x2dc   : > { %v1332_v24 = vmax.f32 %v1316_v53, 0.0  ;;  %v1029_v51 = vadd.f32 %v1009_v36, %v734_v25 }
 0x2de   : > { %1348 = vst [vmem:[%s2519_s16 + $0x30] sm:$0xff] %v1332_v24 }
 0x2e1   : > { %v1283_v9 = vpop.f32.mrf.mxu3 }
 0x2e2   : > { %v1317_v26 = vadd.f32 %v1283_v9, %v1022_v54 }
 0x2e3   : > { %v1012_v11 = vpop.f32.mrf.mxu1 }
 0x2e4   : > { %v1333_v23 = vmax.f32 %v1317_v26, 0.0  ;;  %v1030_v60 = vadd.f32 %v1012_v11, %v735_v48 }
 0x2e6   : > { %1349 = vst [vmem:[%s2519_s16 + $0x38] sm:$0xff] %v1333_v23 }
 0x2e9   : > { %v1286_v10 = vpop.f32.mrf.mxu3 }
 0x2ea   : > { %v1318_v14 = vadd.f32 %v1286_v10, %v1023_v44 }
 0x2ec   : > { %v1334_v45 = vmax.f32 %v1318_v14, 0.0 }
 0x2ee   : > { %1350 = vst [vmem:[%s2519_s16 + $0x40] sm:$0xff] %v1334_v45 }
 0x2f1   : > { %v1289_v8 = vpop.f32.mrf.mxu3 }
 0x2f2   : > { %v1319_v17 = vadd.f32 %v1289_v8, %v1024_v38 }
 0x2f4   : > { %v1335_v4 = vmax.f32 %v1319_v17, 0.0 }
 0x2f6   : > { %1351 = vst [vmem:[%s2519_s16 + $0x48] sm:$0xff] %v1335_v4 }
 0x2f9   : > { %v1292_v47 = vpop.f32.mrf.mxu3 }
 0x2fa   : > { %v1320_v62 = vadd.f32 %v1292_v47, %v1025_v46 }
 0x2fc   : > { %v1336_v57 = vmax.f32 %v1320_v62, 0.0 }
 0x2fe   : > { %1352 = vst [vmem:[%s2519_s16 + $0x50] sm:$0xff] %v1336_v57 }
 0x301   : > { %v1295_v1 = vpop.f32.mrf.mxu3 }
 0x302   : > { %v1321_v33 = vadd.f32 %v1295_v1, %v1026_v19 }
 0x304   : > { %v1337_v12 = vmax.f32 %v1321_v33, 0.0 }
 0x306   : > { %1353 = vst [vmem:[%s2519_s16 + $0x58] sm:$0xff] %v1337_v12 }
 0x309   : > { %v1298_v20 = vpop.f32.mrf.mxu3 }
 0x30a   : > { %v1322_v55 = vadd.f32 %v1298_v20, %v1027_v5 }
 0x30c   : > { %v1338_v13 = vmax.f32 %v1322_v55, 0.0 }
 0x30e   : > { %1354 = vst [vmem:[%s2519_s16 + $0x60] sm:$0xff] %v1338_v13 }
 0x311   : > { %v1301_v40 = vpop.f32.mrf.mxu3 }
 0x312   : > { %v1323_v41 = vadd.f32 %v1301_v40, %v1028_v15 }
 0x314   : > { %v1339_v61 = vmax.f32 %v1323_v41, 0.0 }
 0x316   : > { %1355 = vst [vmem:[%s2519_s16 + $0x68] sm:$0xff] %v1339_v61 }
 0x319   : > { %v1304_v63 = vpop.f32.mrf.mxu3 }
 0x31a   : > { %v1324_v43 = vadd.f32 %v1304_v63, %v1029_v51 }
 0x31c   : > { %v1340_v39 = vmax.f32 %v1324_v43, 0.0 }
 0x31e   : > { %1356 = vst [vmem:[%s2519_s16 + $0x70] sm:$0xff] %v1340_v39 }
 0x321   : > { %v1307_v42 = vpop.f32.mrf.mxu3 }
 0x322   : > { %v1325_v53 = vadd.f32 %v1307_v42, %v1030_v60 }
 0x324   : > { %v1341_v34 = vmax.f32 %v1325_v53, 0.0 }
 0x326   : > { %1357 = vst [vmem:[%s2519_s16 + $0x78] sm:$0xff] %v1341_v34 }
 0x327   : > { %1705 = shalt.err (!%p1702_p7)
}
 0x328   : > { %s1751_s14 = smov 128   ;;  %s1752_s12 = smov 8  }
 0x329   : > { %1631 = dma.vmem_to_hbm [thread:$0]  (%p1831_p9), %s1372_s26, 2048, %s1374_s25, %s1359_s22, %s1751_s14, %s1751_s14, %s1752_s12  }
 0x32a PF: > { %s1388_s15 = sand.u32 1, %s1732_s18   ;;  %p1634_p8 = pnand %p1451_p11, %p1835_p10 }
 0x32b   : > { %s1389_s16 = scalar_lea.sflag [#allocation4], %s1388_s15 }
 0x32c   : > { %p1635_p12 = pneg %p1634_p8 }
 0x32e   : > { %1727 = dma.done.wait (%p1635_p12), %s1389_s16, 2048  }
 0x32f   : > { %1729 = vsyncadd (%p1635_p12), %s1389_s16, 4294965248  ;;  %p18_p13 = scmp.ge.s32.totalorder %s1808_s24, 4   ;;  %s2624_s18 = smov %s1736_s19 }
 0x330   : > { %s2625_s19 = smov %s1740_s20  ;;  %s2626_s20 = smov %s1820_s27 }
 0x331   : > { %s2627_s21 = smov %s1808_s24  ;;  %20 = sbr.rel (!%p18_p13) target bundleno = 5 (0x5), region = 95 }
 0x336   :  { %1395 = vsyncpa [#allocation3], 1 }
 0x337   :  { %1397 = vsyncpa [#allocation3 + $0x1], 1 }
 0x338   :  { %1398 = vsyncpa [#allocation4], 1 }
 0x339   :  { %1400 = vsyncpa [#allocation4 + $0x1], 1 }

</bundles_post_ra>
